<compile_context>
chip_gen: v7x
topology: tpu7x:2x2x1
jax: 0.10.0
libtpu: 0.0.40
codegen_flags: <defaults>
</compile_context>

<pallas_src>
import jax
import jax.numpy as jnp
from jax import lax
from jax.experimental import pallas as pl
from jax.experimental.pallas import tpu as pltpu

LANE = 128      # vreg lane width
SUBLANE = 8     # vreg sublane depth


def _round_up(x, m):
    return ((x + m - 1) // m) * m


# ----------------------------------------------------------------------------
# shared LSTM gate math (gate order i, f, g, o — matches torch.nn.LSTM)
# ----------------------------------------------------------------------------
def _lstm_gates(gates, c, H):
    i = jax.nn.sigmoid(gates[:, 0 * H:1 * H])
    f = jax.nn.sigmoid(gates[:, 1 * H:2 * H])
    g = jnp.tanh(gates[:, 2 * H:3 * H])
    o = jax.nn.sigmoid(gates[:, 3 * H:4 * H])
    c_new = f * c + i * g
    h_new = o * jnp.tanh(c_new)
    return h_new, c_new


# ----------------------------------------------------------------------------
# Encoder kernel: one big input-projection GEMM, then the serial recurrence
# only does h @ W_hh.  emb_ref is the time-major (S*B, H) embedded input.
# ----------------------------------------------------------------------------
def encoder_kernel(emb_ref, wih_ref, whh_ref, b_ref, h_out, c_out, xg_ref):
    B, H = h_out.shape
    SB = emb_ref.shape[0]
    S = SB // B

    # Hoisted input projection: (S*B, H) @ (H, 4H) + (b_ih + b_hh), one GEMM.
    xg_ref[...] = (jnp.dot(emb_ref[...], wih_ref[...],
                           preferred_element_type=jnp.float32) + b_ref[...])

    whh = whh_ref[...]

    def step(t, carry):
        h, c = carry
        row = pl.multiple_of(t * B, B)                       # aligned sublane slice
        gates = xg_ref[pl.ds(row, B), :] + jnp.dot(
            h, whh, preferred_element_type=jnp.float32)
        return _lstm_gates(gates, c, H)

    h0 = jnp.zeros((B, H), jnp.float32)
    c0 = jnp.zeros((B, H), jnp.float32)
    h, c = lax.fori_loop(0, S, step, (h0, c0), unroll=True)
    h_out[...] = h
    c_out[...] = c


# ----------------------------------------------------------------------------
# Fused greedy-decode kernel: all T-1 steps in one kernel; weights stay in
# VMEM; tokens land in one (T-1, B, 1) int32 output slab.
# ----------------------------------------------------------------------------
def decoder_kernel(tok0_ref, emb_ref, wih_ref, whh_ref, b_ref,
                   wout_ref, bout_ref, h0_ref, c0_ref, tok_out):
    B, H = h0_ref.shape
    V = emb_ref.shape[0]                 # padded (lane-aligned) vocab
    T = tok_out.shape[0]                 # number of generated tokens

    emb = emb_ref[...]
    wih = wih_ref[...]
    whh = whh_ref[...]
    b = b_ref[...]
    wout = wout_ref[...]
    bout = bout_ref[...]
    iota_v = lax.broadcasted_iota(jnp.int32, (B, V), 1)      # hoisted out of loop

    def step(t, carry):
        tok, h, c = carry                                    # tok: (B, 1) int32
        # Embedding lookup as a one-hot matmul: cheap at this padded vocab
        # (128 lanes); for a production-size vocab replace with a row gather /
        # DMA gather from the VMEM-resident table and vocab-tile wout.
        onehot = (iota_v == tok).astype(jnp.float32)
        x = jnp.dot(onehot, emb, preferred_element_type=jnp.float32)
        gates = (jnp.dot(x, wih, preferred_element_type=jnp.float32)
                 + jnp.dot(h, whh, preferred_element_type=jnp.float32) + b)
        h_new, c_new = _lstm_gates(gates, c, H)
        logits = jnp.dot(h_new, wout, preferred_element_type=jnp.float32) + bout
        mx = jnp.max(logits, axis=-1, keepdims=True)
        idx = jnp.min(jnp.where(logits == mx, iota_v, V),
                      axis=-1, keepdims=True).astype(jnp.int32)   # first argmax
        tok_out[t] = idx
        return idx, h_new, c_new

    lax.fori_loop(0, T, step,
                  (tok0_ref[...], h0_ref[...], c0_ref[...]), unroll=True)


# ----------------------------------------------------------------------------
# Pallas wrappers (whole arrays VMEM-resident; shapes are small and padded)
# ----------------------------------------------------------------------------
def _vmem_specs(n):
    return [pl.BlockSpec(memory_space=pltpu.MemorySpace.VMEM) for _ in range(n)]


_CPARAMS = pltpu.CompilerParams(vmem_limit_bytes=32 * 1024 * 1024)


def encoder_forward(emb_2d, wih, whh, b, B):
    SB, H = emb_2d.shape
    return pl.pallas_call(
        encoder_kernel,
        out_shape=(jax.ShapeDtypeStruct((B, H), jnp.float32),
                   jax.ShapeDtypeStruct((B, H), jnp.float32)),
        in_specs=_vmem_specs(4),
        out_specs=tuple(_vmem_specs(2)),
        scratch_shapes=[pltpu.VMEM((SB, 4 * H), jnp.float32)],
        compiler_params=_CPARAMS,
    )(emb_2d, wih, whh, b)


def decoder_decode(tok0, dec_emb, wih, whh, b, wout, bout, h, c, n_steps):
    B, H = h.shape
    return pl.pallas_call(
        decoder_kernel,
        out_shape=jax.ShapeDtypeStruct((n_steps, B, 1), jnp.int32),
        in_specs=_vmem_specs(9),
        out_specs=pl.BlockSpec(memory_space=pltpu.MemorySpace.VMEM),
        compiler_params=_CPARAMS,
    )(tok0, dec_emb, wih, whh, b, wout, bout, h, c)


@jax.jit
def seq2seq_forward(params, input_seq, target_seq):
    """Matches Seq2Seq.forward: returns (B, T-1) int32 greedy tokens."""
    B, S = input_seq.shape
    T = target_seq.shape[1]
    H = params["enc_wih"].shape[0]
    V = params["wout"].shape[1]

    Bp = _round_up(max(B, 1), SUBLANE)       # pad batch to sublane tile
    Vp = _round_up(max(V, 1), LANE)          # pad vocab to lane tile

    # ---- batch padding (padded rows compute garbage, discarded at the end) --
    inp = jnp.zeros((Bp, S), jnp.int32).at[:B].set(input_seq.astype(jnp.int32))
    tok0 = jnp.zeros((Bp, 1), jnp.int32).at[:B].set(
        target_seq[:, 0:1].astype(jnp.int32))

    # ---- vocab padding: padded logit columns get -1e30 bias (never argmax) --
    dec_emb = jnp.zeros((Vp, H), jnp.float32).at[:V].set(params["dec_emb"])
    wout = jnp.zeros((H, Vp), jnp.float32).at[:, :V].set(params["wout"])
    bout = jnp.full((1, Vp), -1e30, jnp.float32).at[:, :V].set(params["bout"])

    # ---- encoder: gather embedding directly time-major (no HBM transpose) ---
    # Embedding lookup with trace-time token ids is plain-JAX glue.
    emb_tm = jnp.take(params["enc_emb"], inp.T, axis=0)       # (S, Bp, H)
    emb_2d = emb_tm.reshape(S * Bp, H)                        # free reshape
    h, c = encoder_forward(emb_2d, params["enc_wih"], params["enc_whh"],
                           params["enc_b"], Bp)

    # ---- fused greedy decode: ONE kernel for all T-1 steps ------------------
    toks = decoder_decode(tok0, dec_emb, params["dec_wih"], params["dec_whh"],
                          params["dec_b"], wout, bout, h, c, T - 1)
    return jnp.transpose(toks[:, :B, 0], (1, 0))              # (B, T-1)


# ----------------------------------------------------------------------------
# Deterministic parameter construction (real, unpadded shapes)
# ----------------------------------------------------------------------------
def make_params(key, vocab, hidden):
    k = 1.0 / jnp.sqrt(jnp.float32(hidden))
    keys = jax.random.split(key, 12)
    u = lambda kk, shape: jax.random.uniform(kk, shape, jnp.float32, -k, k)
    return {
        # encoder
        "enc_emb": u(keys[0], (vocab, hidden)),
        "enc_wih": u(keys[1], (hidden, 4 * hidden)),     # W_ih^T
        "enc_whh": u(keys[2], (hidden, 4 * hidden)),     # W_hh^T
        "enc_b":   u(keys[3], (1, 4 * hidden)) + u(keys[4], (1, 4 * hidden)),
        # decoder
        "dec_emb": u(keys[5], (vocab, hidden)),
        "dec_wih": u(keys[6], (hidden, 4 * hidden)),
        "dec_whh": u(keys[7], (hidden, 4 * hidden)),
        "dec_b":   u(keys[8], (1, 4 * hidden)) + u(keys[9], (1, 4 * hidden)),
        # fc_out
        "wout":    u(keys[10], (hidden, vocab)),
        "bout":    u(keys[11], (1, vocab)),
    }


if __name__ == "__main__":
    VOCAB = 11        # digits 0-9 + <pad>
    HIDDEN = 32       # small stand-in for hidden_size=256
    B, S_IN, S_OUT = 2, 6, 5

    key = jax.random.PRNGKey(0)
    kp, ki, kt = jax.random.split(key, 3)
    params = make_params(kp, VOCAB, HIDDEN)

    input_seq = jax.random.randint(ki, (B, S_IN), 0, VOCAB, dtype=jnp.int32)
    target_seq = jax.random.randint(kt, (B, S_OUT), 0, VOCAB, dtype=jnp.int32)

    out = seq2seq_forward(params, input_seq, target_seq)   # (B, S_OUT - 1) int32
    jax.block_until_ready(out)
    assert out.shape == (B, S_OUT - 1)
    assert bool(jnp.all((out >= 0) & (out < VOCAB)))
    print("KERNEL_OK")
</pallas_src>

<mosaic_0001>
module attributes {stable_mosaic.version = 11 : i64} {
  func.func @encoder_kernel(%arg0: memref<48x32xf32, #tpu.memory_space<vmem>>, %arg1: memref<32x128xf32, #tpu.memory_space<vmem>>, %arg2: memref<32x128xf32, #tpu.memory_space<vmem>>, %arg3: memref<1x128xf32, #tpu.memory_space<vmem>>, %arg4: memref<8x32xf32, #tpu.memory_space<vmem>>, %arg5: memref<8x32xf32, #tpu.memory_space<vmem>>, %arg6: memref<48x128xf32, #tpu.memory_space<vmem>>) attributes {dimension_semantics = [], scalar_prefetch = 0 : i64, scratch_operands = 1 : i64, tpu.core_type = #tpu.core_type<tc>} {
    %c0 = arith.constant 0 : index
    %c0_0 = arith.constant 0 : index
    %0 = vector.load %arg0[%c0, %c0_0] : memref<48x32xf32, #tpu.memory_space<vmem>>, vector<48x32xf32>
    %c0_1 = arith.constant 0 : index
    %c0_2 = arith.constant 0 : index
    %1 = vector.load %arg1[%c0_1, %c0_2] : memref<32x128xf32, #tpu.memory_space<vmem>>, vector<32x128xf32>
    %cst = arith.constant dense<0.000000e+00> : vector<48x128xf32>
    %2 = tpu.matmul %0, %1, %cst {dimension_numbers = #tpu.dot_dimension_numbers<[1], [0], [0], [1], [0, 0, 1, 1], [], []>} : vector<48x32xf32>, vector<32x128xf32>, vector<48x128xf32> -> vector<48x128xf32>
    %c0_3 = arith.constant 0 : index
    %c0_4 = arith.constant 0 : index
    %3 = vector.load %arg3[%c0_3, %c0_4] : memref<1x128xf32, #tpu.memory_space<vmem>>, vector<1x128xf32>
    %4 = vector.broadcast %3 : vector<1x128xf32> to vector<48x128xf32>
    %5 = arith.addf %2, %4 : vector<48x128xf32>
    %c0_5 = arith.constant 0 : index
    %c0_6 = arith.constant 0 : index
    %6 = vector.load %arg6[%c0_5, %c0_6] : memref<48x128xf32, #tpu.memory_space<vmem>>, vector<48x128xf32>
    tpu.vector_store %arg6[%c0_5, %c0_6], %5 {strides = array<i32>} : memref<48x128xf32, #tpu.memory_space<vmem>>, vector<48x128xf32>,
    %c0_7 = arith.constant 0 : index
    %c0_8 = arith.constant 0 : index
    %7 = vector.load %arg2[%c0_7, %c0_8] : memref<32x128xf32, #tpu.memory_space<vmem>>, vector<32x128xf32>
    %cst_9 = arith.constant 0.000000e+00 : f32
    %8 = vector.broadcast %cst_9 : f32 to vector<8x32xf32>
    %cst_10 = arith.constant 0.000000e+00 : f32
    %9 = vector.broadcast %cst_10 : f32 to vector<8x32xf32>
    %c0_i32 = arith.constant 0 : i32
    %c8_i32 = arith.constant 8 : i32
    %10 = arith.muli %c0_i32, %c8_i32 : i32
    %11 = tpu.assume_multiple %10, 8 : i32
    %12 = arith.index_cast %11 : i32 to index
    %c0_11 = arith.constant 0 : index
    %13 = vector.load %arg6[%12, %c0_11] : memref<48x128xf32, #tpu.memory_space<vmem>>, vector<8x128xf32>
    %cst_12 = arith.constant dense<0.000000e+00> : vector<8x128xf32>
    %14 = tpu.matmul %8, %7, %cst_12 {dimension_numbers = #tpu.dot_dimension_numbers<[1], [0], [0], [1], [0, 0, 1, 1], [], []>} : vector<8x32xf32>, vector<32x128xf32>, vector<8x128xf32> -> vector<8x128xf32>
    %15 = arith.addf %13, %14 : vector<8x128xf32>
    %16 = vector.extract_strided_slice %15 {offsets = [0, 0], sizes = [8, 32], strides = [1, 1]} : vector<8x128xf32> to vector<8x32xf32>
    %17 = arith.negf %16 : vector<8x32xf32>
    %18 = math.exp %17 : vector<8x32xf32>
    %cst_13 = arith.constant 1.000000e+00 : f32
    %19 = vector.broadcast %cst_13 : f32 to vector<8x32xf32>
    %20 = arith.addf %19, %18 : vector<8x32xf32>
    %21 = arith.divf %19, %20 : vector<8x32xf32>
    %22 = vector.extract_strided_slice %15 {offsets = [0, 32], sizes = [8, 32], strides = [1, 1]} : vector<8x128xf32> to vector<8x32xf32>
    %23 = arith.negf %22 : vector<8x32xf32>
    %24 = math.exp %23 : vector<8x32xf32>
    %cst_14 = arith.constant 1.000000e+00 : f32
    %25 = vector.broadcast %cst_14 : f32 to vector<8x32xf32>
    %26 = arith.addf %25, %24 : vector<8x32xf32>
    %27 = arith.divf %25, %26 : vector<8x32xf32>
    %28 = vector.extract_strided_slice %15 {offsets = [0, 64], sizes = [8, 32], strides = [1, 1]} : vector<8x128xf32> to vector<8x32xf32>
    %29 = math.tanh %28 : vector<8x32xf32>
    %30 = vector.extract_strided_slice %15 {offsets = [0, 96], sizes = [8, 32], strides = [1, 1]} : vector<8x128xf32> to vector<8x32xf32>
    %31 = arith.negf %30 : vector<8x32xf32>
    %32 = math.exp %31 : vector<8x32xf32>
    %cst_15 = arith.constant 1.000000e+00 : f32
    %33 = vector.broadcast %cst_15 : f32 to vector<8x32xf32>
    %34 = arith.addf %33, %32 : vector<8x32xf32>
    %35 = arith.divf %33, %34 : vector<8x32xf32>
    %36 = arith.mulf %27, %9 : vector<8x32xf32>
    %37 = arith.mulf %21, %29 : vector<8x32xf32>
    %38 = arith.addf %36, %37 : vector<8x32xf32>
    %39 = math.tanh %38 : vector<8x32xf32>
    %40 = arith.mulf %35, %39 : vector<8x32xf32>
    %c1_i32 = arith.constant 1 : i32
    %c8_i32_16 = arith.constant 8 : i32
    %41 = arith.muli %c1_i32, %c8_i32_16 : i32
    %42 = tpu.assume_multiple %41, 8 : i32
    %43 = arith.index_cast %42 : i32 to index
    %c0_17 = arith.constant 0 : index
    %44 = vector.load %arg6[%43, %c0_17] : memref<48x128xf32, #tpu.memory_space<vmem>>, vector<8x128xf32>
    %cst_18 = arith.constant dense<0.000000e+00> : vector<8x128xf32>
    %45 = tpu.matmul %40, %7, %cst_18 {dimension_numbers = #tpu.dot_dimension_numbers<[1], [0], [0], [1], [0, 0, 1, 1], [], []>} : vector<8x32xf32>, vector<32x128xf32>, vector<8x128xf32> -> vector<8x128xf32>
    %46 = arith.addf %44, %45 : vector<8x128xf32>
    %47 = vector.extract_strided_slice %46 {offsets = [0, 0], sizes = [8, 32], strides = [1, 1]} : vector<8x128xf32> to vector<8x32xf32>
    %48 = arith.negf %47 : vector<8x32xf32>
    %49 = math.exp %48 : vector<8x32xf32>
    %cst_19 = arith.constant 1.000000e+00 : f32
    %50 = vector.broadcast %cst_19 : f32 to vector<8x32xf32>
    %51 = arith.addf %50, %49 : vector<8x32xf32>
    %52 = arith.divf %50, %51 : vector<8x32xf32>
    %53 = vector.extract_strided_slice %46 {offsets = [0, 32], sizes = [8, 32], strides = [1, 1]} : vector<8x128xf32> to vector<8x32xf32>
    %54 = arith.negf %53 : vector<8x32xf32>
    %55 = math.exp %54 : vector<8x32xf32>
    %cst_20 = arith.constant 1.000000e+00 : f32
    %56 = vector.broadcast %cst_20 : f32 to vector<8x32xf32>
    %57 = arith.addf %56, %55 : vector<8x32xf32>
    %58 = arith.divf %56, %57 : vector<8x32xf32>
    %59 = vector.extract_strided_slice %46 {offsets = [0, 64], sizes = [8, 32], strides = [1, 1]} : vector<8x128xf32> to vector<8x32xf32>
    %60 = math.tanh %59 : vector<8x32xf32>
    %61 = vector.extract_strided_slice %46 {offsets = [0, 96], sizes = [8, 32], strides = [1, 1]} : vector<8x128xf32> to vector<8x32xf32>
    %62 = arith.negf %61 : vector<8x32xf32>
    %63 = math.exp %62 : vector<8x32xf32>
    %cst_21 = arith.constant 1.000000e+00 : f32
    %64 = vector.broadcast %cst_21 : f32 to vector<8x32xf32>
    %65 = arith.addf %64, %63 : vector<8x32xf32>
    %66 = arith.divf %64, %65 : vector<8x32xf32>
    %67 = arith.mulf %58, %38 : vector<8x32xf32>
    %68 = arith.mulf %52, %60 : vector<8x32xf32>
    %69 = arith.addf %67, %68 : vector<8x32xf32>
    %70 = math.tanh %69 : vector<8x32xf32>
    %71 = arith.mulf %66, %70 : vector<8x32xf32>
    %c2_i32 = arith.constant 2 : i32
    %c8_i32_22 = arith.constant 8 : i32
    %72 = arith.muli %c2_i32, %c8_i32_22 : i32
    %73 = tpu.assume_multiple %72, 8 : i32
    %74 = arith.index_cast %73 : i32 to index
    %c0_23 = arith.constant 0 : index
    %75 = vector.load %arg6[%74, %c0_23] : memref<48x128xf32, #tpu.memory_space<vmem>>, vector<8x128xf32>
    %cst_24 = arith.constant dense<0.000000e+00> : vector<8x128xf32>
    %76 = tpu.matmul %71, %7, %cst_24 {dimension_numbers = #tpu.dot_dimension_numbers<[1], [0], [0], [1], [0, 0, 1, 1], [], []>} : vector<8x32xf32>, vector<32x128xf32>, vector<8x128xf32> -> vector<8x128xf32>
    %77 = arith.addf %75, %76 : vector<8x128xf32>
    %78 = vector.extract_strided_slice %77 {offsets = [0, 0], sizes = [8, 32], strides = [1, 1]} : vector<8x128xf32> to vector<8x32xf32>
    %79 = arith.negf %78 : vector<8x32xf32>
    %80 = math.exp %79 : vector<8x32xf32>
    %cst_25 = arith.constant 1.000000e+00 : f32
    %81 = vector.broadcast %cst_25 : f32 to vector<8x32xf32>
    %82 = arith.addf %81, %80 : vector<8x32xf32>
    %83 = arith.divf %81, %82 : vector<8x32xf32>
    %84 = vector.extract_strided_slice %77 {offsets = [0, 32], sizes = [8, 32], strides = [1, 1]} : vector<8x128xf32> to vector<8x32xf32>
    %85 = arith.negf %84 : vector<8x32xf32>
    %86 = math.exp %85 : vector<8x32xf32>
    %cst_26 = arith.constant 1.000000e+00 : f32
    %87 = vector.broadcast %cst_26 : f32 to vector<8x32xf32>
    %88 = arith.addf %87, %86 : vector<8x32xf32>
    %89 = arith.divf %87, %88 : vector<8x32xf32>
    %90 = vector.extract_strided_slice %77 {offsets = [0, 64], sizes = [8, 32], strides = [1, 1]} : vector<8x128xf32> to vector<8x32xf32>
    %91 = math.tanh %90 : vector<8x32xf32>
    %92 = vector.extract_strided_slice %77 {offsets = [0, 96], sizes = [8, 32], strides = [1, 1]} : vector<8x128xf32> to vector<8x32xf32>
    %93 = arith.negf %92 : vector<8x32xf32>
    %94 = math.exp %93 : vector<8x32xf32>
    %cst_27 = arith.constant 1.000000e+00 : f32
    %95 = vector.broadcast %cst_27 : f32 to vector<8x32xf32>
    %96 = arith.addf %95, %94 : vector<8x32xf32>
    %97 = arith.divf %95, %96 : vector<8x32xf32>
    %98 = arith.mulf %89, %69 : vector<8x32xf32>
    %99 = arith.mulf %83, %91 : vector<8x32xf32>
    %100 = arith.addf %98, %99 : vector<8x32xf32>
    %101 = math.tanh %100 : vector<8x32xf32>
    %102 = arith.mulf %97, %101 : vector<8x32xf32>
    %c3_i32 = arith.constant 3 : i32
    %c8_i32_28 = arith.constant 8 : i32
    %103 = arith.muli %c3_i32, %c8_i32_28 : i32
    %104 = tpu.assume_multiple %103, 8 : i32
    %105 = arith.index_cast %104 : i32 to index
    %c0_29 = arith.constant 0 : index
    %106 = vector.load %arg6[%105, %c0_29] : memref<48x128xf32, #tpu.memory_space<vmem>>, vector<8x128xf32>
    %cst_30 = arith.constant dense<0.000000e+00> : vector<8x128xf32>
    %107 = tpu.matmul %102, %7, %cst_30 {dimension_numbers = #tpu.dot_dimension_numbers<[1], [0], [0], [1], [0, 0, 1, 1], [], []>} : vector<8x32xf32>, vector<32x128xf32>, vector<8x128xf32> -> vector<8x128xf32>
    %108 = arith.addf %106, %107 : vector<8x128xf32>
    %109 = vector.extract_strided_slice %108 {offsets = [0, 0], sizes = [8, 32], strides = [1, 1]} : vector<8x128xf32> to vector<8x32xf32>
    %110 = arith.negf %109 : vector<8x32xf32>
    %111 = math.exp %110 : vector<8x32xf32>
    %cst_31 = arith.constant 1.000000e+00 : f32
    %112 = vector.broadcast %cst_31 : f32 to vector<8x32xf32>
    %113 = arith.addf %112, %111 : vector<8x32xf32>
    %114 = arith.divf %112, %113 : vector<8x32xf32>
    %115 = vector.extract_strided_slice %108 {offsets = [0, 32], sizes = [8, 32], strides = [1, 1]} : vector<8x128xf32> to vector<8x32xf32>
    %116 = arith.negf %115 : vector<8x32xf32>
    %117 = math.exp %116 : vector<8x32xf32>
    %cst_32 = arith.constant 1.000000e+00 : f32
    %118 = vector.broadcast %cst_32 : f32 to vector<8x32xf32>
    %119 = arith.addf %118, %117 : vector<8x32xf32>
    %120 = arith.divf %118, %119 : vector<8x32xf32>
    %121 = vector.extract_strided_slice %108 {offsets = [0, 64], sizes = [8, 32], strides = [1, 1]} : vector<8x128xf32> to vector<8x32xf32>
    %122 = math.tanh %121 : vector<8x32xf32>
    %123 = vector.extract_strided_slice %108 {offsets = [0, 96], sizes = [8, 32], strides = [1, 1]} : vector<8x128xf32> to vector<8x32xf32>
    %124 = arith.negf %123 : vector<8x32xf32>
    %125 = math.exp %124 : vector<8x32xf32>
    %cst_33 = arith.constant 1.000000e+00 : f32
    %126 = vector.broadcast %cst_33 : f32 to vector<8x32xf32>
    %127 = arith.addf %126, %125 : vector<8x32xf32>
    %128 = arith.divf %126, %127 : vector<8x32xf32>
    %129 = arith.mulf %120, %100 : vector<8x32xf32>
    %130 = arith.mulf %114, %122 : vector<8x32xf32>
    %131 = arith.addf %129, %130 : vector<8x32xf32>
    %132 = math.tanh %131 : vector<8x32xf32>
    %133 = arith.mulf %128, %132 : vector<8x32xf32>
    %c4_i32 = arith.constant 4 : i32
    %c8_i32_34 = arith.constant 8 : i32
    %134 = arith.muli %c4_i32, %c8_i32_34 : i32
    %135 = tpu.assume_multiple %134, 8 : i32
    %136 = arith.index_cast %135 : i32 to index
    %c0_35 = arith.constant 0 : index
    %137 = vector.load %arg6[%136, %c0_35] : memref<48x128xf32, #tpu.memory_space<vmem>>, vector<8x128xf32>
    %cst_36 = arith.constant dense<0.000000e+00> : vector<8x128xf32>
    %138 = tpu.matmul %133, %7, %cst_36 {dimension_numbers = #tpu.dot_dimension_numbers<[1], [0], [0], [1], [0, 0, 1, 1], [], []>} : vector<8x32xf32>, vector<32x128xf32>, vector<8x128xf32> -> vector<8x128xf32>
    %139 = arith.addf %137, %138 : vector<8x128xf32>
    %140 = vector.extract_strided_slice %139 {offsets = [0, 0], sizes = [8, 32], strides = [1, 1]} : vector<8x128xf32> to vector<8x32xf32>
    %141 = arith.negf %140 : vector<8x32xf32>
    %142 = math.exp %141 : vector<8x32xf32>
    %cst_37 = arith.constant 1.000000e+00 : f32
    %143 = vector.broadcast %cst_37 : f32 to vector<8x32xf32>
    %144 = arith.addf %143, %142 : vector<8x32xf32>
    %145 = arith.divf %143, %144 : vector<8x32xf32>
    %146 = vector.extract_strided_slice %139 {offsets = [0, 32], sizes = [8, 32], strides = [1, 1]} : vector<8x128xf32> to vector<8x32xf32>
    %147 = arith.negf %146 : vector<8x32xf32>
    %148 = math.exp %147 : vector<8x32xf32>
    %cst_38 = arith.constant 1.000000e+00 : f32
    %149 = vector.broadcast %cst_38 : f32 to vector<8x32xf32>
    %150 = arith.addf %149, %148 : vector<8x32xf32>
    %151 = arith.divf %149, %150 : vector<8x32xf32>
    %152 = vector.extract_strided_slice %139 {offsets = [0, 64], sizes = [8, 32], strides = [1, 1]} : vector<8x128xf32> to vector<8x32xf32>
    %153 = math.tanh %152 : vector<8x32xf32>
    %154 = vector.extract_strided_slice %139 {offsets = [0, 96], sizes = [8, 32], strides = [1, 1]} : vector<8x128xf32> to vector<8x32xf32>
    %155 = arith.negf %154 : vector<8x32xf32>
    %156 = math.exp %155 : vector<8x32xf32>
    %cst_39 = arith.constant 1.000000e+00 : f32
    %157 = vector.broadcast %cst_39 : f32 to vector<8x32xf32>
    %158 = arith.addf %157, %156 : vector<8x32xf32>
    %159 = arith.divf %157, %158 : vector<8x32xf32>
    %160 = arith.mulf %151, %131 : vector<8x32xf32>
    %161 = arith.mulf %145, %153 : vector<8x32xf32>
    %162 = arith.addf %160, %161 : vector<8x32xf32>
    %163 = math.tanh %162 : vector<8x32xf32>
    %164 = arith.mulf %159, %163 : vector<8x32xf32>
    %c5_i32 = arith.constant 5 : i32
    %c8_i32_40 = arith.constant 8 : i32
    %165 = arith.muli %c5_i32, %c8_i32_40 : i32
    %166 = tpu.assume_multiple %165, 8 : i32
    %167 = arith.index_cast %166 : i32 to index
    %c0_41 = arith.constant 0 : index
    %168 = vector.load %arg6[%167, %c0_41] : memref<48x128xf32, #tpu.memory_space<vmem>>, vector<8x128xf32>
    %cst_42 = arith.constant dense<0.000000e+00> : vector<8x128xf32>
    %169 = tpu.matmul %164, %7, %cst_42 {dimension_numbers = #tpu.dot_dimension_numbers<[1], [0], [0], [1], [0, 0, 1, 1], [], []>} : vector<8x32xf32>, vector<32x128xf32>, vector<8x128xf32> -> vector<8x128xf32>
    %170 = arith.addf %168, %169 : vector<8x128xf32>
    %171 = vector.extract_strided_slice %170 {offsets = [0, 0], sizes = [8, 32], strides = [1, 1]} : vector<8x128xf32> to vector<8x32xf32>
    %172 = arith.negf %171 : vector<8x32xf32>
    %173 = math.exp %172 : vector<8x32xf32>
    %cst_43 = arith.constant 1.000000e+00 : f32
    %174 = vector.broadcast %cst_43 : f32 to vector<8x32xf32>
    %175 = arith.addf %174, %173 : vector<8x32xf32>
    %176 = arith.divf %174, %175 : vector<8x32xf32>
    %177 = vector.extract_strided_slice %170 {offsets = [0, 32], sizes = [8, 32], strides = [1, 1]} : vector<8x128xf32> to vector<8x32xf32>
    %178 = arith.negf %177 : vector<8x32xf32>
    %179 = math.exp %178 : vector<8x32xf32>
    %cst_44 = arith.constant 1.000000e+00 : f32
    %180 = vector.broadcast %cst_44 : f32 to vector<8x32xf32>
    %181 = arith.addf %180, %179 : vector<8x32xf32>
    %182 = arith.divf %180, %181 : vector<8x32xf32>
    %183 = vector.extract_strided_slice %170 {offsets = [0, 64], sizes = [8, 32], strides = [1, 1]} : vector<8x128xf32> to vector<8x32xf32>
    %184 = math.tanh %183 : vector<8x32xf32>
    %185 = vector.extract_strided_slice %170 {offsets = [0, 96], sizes = [8, 32], strides = [1, 1]} : vector<8x128xf32> to vector<8x32xf32>
    %186 = arith.negf %185 : vector<8x32xf32>
    %187 = math.exp %186 : vector<8x32xf32>
    %cst_45 = arith.constant 1.000000e+00 : f32
    %188 = vector.broadcast %cst_45 : f32 to vector<8x32xf32>
    %189 = arith.addf %188, %187 : vector<8x32xf32>
    %190 = arith.divf %188, %189 : vector<8x32xf32>
    %191 = arith.mulf %182, %162 : vector<8x32xf32>
    %192 = arith.mulf %176, %184 : vector<8x32xf32>
    %193 = arith.addf %191, %192 : vector<8x32xf32>
    %194 = math.tanh %193 : vector<8x32xf32>
    %195 = arith.mulf %190, %194 : vector<8x32xf32>
    %c6_i32 = arith.constant 6 : i32
    %c0_46 = arith.constant 0 : index
    %c0_47 = arith.constant 0 : index
    %196 = vector.load %arg4[%c0_46, %c0_47] : memref<8x32xf32, #tpu.memory_space<vmem>>, vector<8x32xf32>
    tpu.vector_store %arg4[%c0_46, %c0_47], %195 {strides = array<i32>} : memref<8x32xf32, #tpu.memory_space<vmem>>, vector<8x32xf32>,
    %c0_48 = arith.constant 0 : index
    %c0_49 = arith.constant 0 : index
    %197 = vector.load %arg5[%c0_48, %c0_49] : memref<8x32xf32, #tpu.memory_space<vmem>>, vector<8x32xf32>
    tpu.vector_store %arg5[%c0_48, %c0_49], %193 {strides = array<i32>} : memref<8x32xf32, #tpu.memory_space<vmem>>, vector<8x32xf32>,
    return
  }
}

module attributes {stable_mosaic.version = 11 : i64} {
  func.func @decoder_kernel(%arg0: memref<8x1xi32, #tpu.memory_space<vmem>>, %arg1: memref<128x32xf32, #tpu.memory_space<vmem>>, %arg2: memref<32x128xf32, #tpu.memory_space<vmem>>, %arg3: memref<32x128xf32, #tpu.memory_space<vmem>>, %arg4: memref<1x128xf32, #tpu.memory_space<vmem>>, %arg5: memref<32x128xf32, #tpu.memory_space<vmem>>, %arg6: memref<1x128xf32, #tpu.memory_space<vmem>>, %arg7: memref<8x32xf32, #tpu.memory_space<vmem>>, %arg8: memref<8x32xf32, #tpu.memory_space<vmem>>, %arg9: memref<4x8x1xi32, #tpu.memory_space<vmem>>) attributes {dimension_semantics = [], scalar_prefetch = 0 : i64, scratch_operands = 0 : i64, tpu.core_type = #tpu.core_type<tc>} {
    %c0 = arith.constant 0 : index
    %c0_0 = arith.constant 0 : index
    %0 = vector.load %arg1[%c0, %c0_0] : memref<128x32xf32, #tpu.memory_space<vmem>>, vector<128x32xf32>
    %c0_1 = arith.constant 0 : index
    %c0_2 = arith.constant 0 : index
    %1 = vector.load %arg2[%c0_1, %c0_2] : memref<32x128xf32, #tpu.memory_space<vmem>>, vector<32x128xf32>
    %c0_3 = arith.constant 0 : index
    %c0_4 = arith.constant 0 : index
    %2 = vector.load %arg3[%c0_3, %c0_4] : memref<32x128xf32, #tpu.memory_space<vmem>>, vector<32x128xf32>
    %c0_5 = arith.constant 0 : index
    %c0_6 = arith.constant 0 : index
    %3 = vector.load %arg4[%c0_5, %c0_6] : memref<1x128xf32, #tpu.memory_space<vmem>>, vector<1x128xf32>
    %c0_7 = arith.constant 0 : index
    %c0_8 = arith.constant 0 : index
    %4 = vector.load %arg5[%c0_7, %c0_8] : memref<32x128xf32, #tpu.memory_space<vmem>>, vector<32x128xf32>
    %c0_9 = arith.constant 0 : index
    %c0_10 = arith.constant 0 : index
    %5 = vector.load %arg6[%c0_9, %c0_10] : memref<1x128xf32, #tpu.memory_space<vmem>>, vector<1x128xf32>
    %6 = tpu.iota {dimensions = array<i32: 1>} : vector<8x128xi32>
    %c0_11 = arith.constant 0 : index
    %c0_12 = arith.constant 0 : index
    %7 = vector.load %arg0[%c0_11, %c0_12] : memref<8x1xi32, #tpu.memory_space<vmem>>, vector<8x1xi32>
    %c0_13 = arith.constant 0 : index
    %c0_14 = arith.constant 0 : index
    %8 = vector.load %arg7[%c0_13, %c0_14] : memref<8x32xf32, #tpu.memory_space<vmem>>, vector<8x32xf32>
    %c0_15 = arith.constant 0 : index
    %c0_16 = arith.constant 0 : index
    %9 = vector.load %arg8[%c0_15, %c0_16] : memref<8x32xf32, #tpu.memory_space<vmem>>, vector<8x32xf32>
    %c0_i32 = arith.constant 0 : i32
    %10 = vector.broadcast %7 : vector<8x1xi32> to vector<8x128xi32>
    %11 = arith.cmpi eq, %6, %10 : vector<8x128xi32>
    %12 = arith.extui %11 : vector<8x128xi1> to vector<8x128xi32>
    %13 = arith.sitofp %12 : vector<8x128xi32> to vector<8x128xf32>
    %cst = arith.constant dense<0.000000e+00> : vector<8x32xf32>
    %14 = tpu.matmul %13, %0, %cst {dimension_numbers = #tpu.dot_dimension_numbers<[1], [0], [0], [1], [0, 0, 1, 1], [], []>} : vector<8x128xf32>, vector<128x32xf32>, vector<8x32xf32> -> vector<8x32xf32>
    %cst_17 = arith.constant dense<0.000000e+00> : vector<8x128xf32>
    %15 = tpu.matmul %14, %1, %cst_17 {dimension_numbers = #tpu.dot_dimension_numbers<[1], [0], [0], [1], [0, 0, 1, 1], [], []>} : vector<8x32xf32>, vector<32x128xf32>, vector<8x128xf32> -> vector<8x128xf32>
    %cst_18 = arith.constant dense<0.000000e+00> : vector<8x128xf32>
    %16 = tpu.matmul %8, %2, %cst_18 {dimension_numbers = #tpu.dot_dimension_numbers<[1], [0], [0], [1], [0, 0, 1, 1], [], []>} : vector<8x32xf32>, vector<32x128xf32>, vector<8x128xf32> -> vector<8x128xf32>
    %17 = arith.addf %15, %16 : vector<8x128xf32>
    %18 = vector.broadcast %3 : vector<1x128xf32> to vector<8x128xf32>
    %19 = arith.addf %17, %18 : vector<8x128xf32>
    %20 = vector.extract_strided_slice %19 {offsets = [0, 0], sizes = [8, 32], strides = [1, 1]} : vector<8x128xf32> to vector<8x32xf32>
    %21 = arith.negf %20 : vector<8x32xf32>
    %22 = math.exp %21 : vector<8x32xf32>
    %cst_19 = arith.constant 1.000000e+00 : f32
    %23 = vector.broadcast %cst_19 : f32 to vector<8x32xf32>
    %24 = arith.addf %23, %22 : vector<8x32xf32>
    %25 = arith.divf %23, %24 : vector<8x32xf32>
    %26 = vector.extract_strided_slice %19 {offsets = [0, 32], sizes = [8, 32], strides = [1, 1]} : vector<8x128xf32> to vector<8x32xf32>
    %27 = arith.negf %26 : vector<8x32xf32>
    %28 = math.exp %27 : vector<8x32xf32>
    %cst_20 = arith.constant 1.000000e+00 : f32
    %29 = vector.broadcast %cst_20 : f32 to vector<8x32xf32>
    %30 = arith.addf %29, %28 : vector<8x32xf32>
    %31 = arith.divf %29, %30 : vector<8x32xf32>
    %32 = vector.extract_strided_slice %19 {offsets = [0, 64], sizes = [8, 32], strides = [1, 1]} : vector<8x128xf32> to vector<8x32xf32>
    %33 = math.tanh %32 : vector<8x32xf32>
    %34 = vector.extract_strided_slice %19 {offsets = [0, 96], sizes = [8, 32], strides = [1, 1]} : vector<8x128xf32> to vector<8x32xf32>
    %35 = arith.negf %34 : vector<8x32xf32>
    %36 = math.exp %35 : vector<8x32xf32>
    %cst_21 = arith.constant 1.000000e+00 : f32
    %37 = vector.broadcast %cst_21 : f32 to vector<8x32xf32>
    %38 = arith.addf %37, %36 : vector<8x32xf32>
    %39 = arith.divf %37, %38 : vector<8x32xf32>
    %40 = arith.mulf %31, %9 : vector<8x32xf32>
    %41 = arith.mulf %25, %33 : vector<8x32xf32>
    %42 = arith.addf %40, %41 : vector<8x32xf32>
    %43 = math.tanh %42 : vector<8x32xf32>
    %44 = arith.mulf %39, %43 : vector<8x32xf32>
    %cst_22 = arith.constant dense<0.000000e+00> : vector<8x128xf32>
    %45 = tpu.matmul %44, %4, %cst_22 {dimension_numbers = #tpu.dot_dimension_numbers<[1], [0], [0], [1], [0, 0, 1, 1], [], []>} : vector<8x32xf32>, vector<32x128xf32>, vector<8x128xf32> -> vector<8x128xf32>
    %46 = vector.broadcast %5 : vector<1x128xf32> to vector<8x128xf32>
    %47 = arith.addf %45, %46 : vector<8x128xf32>
    %cst_23 = arith.constant dense<0xFF800000> : vector<8xf32>
    %48 = vector.multi_reduction <maximumf>, %47, %cst_23 [1] : vector<8x128xf32> to vector<8xf32>
    %49 = vector.shape_cast %48 : vector<8xf32> to vector<8x1xf32>
    %50 = vector.broadcast %49 : vector<8x1xf32> to vector<8x128xf32>
    %51 = arith.cmpf oeq, %47, %50 : vector<8x128xf32>
    %c128_i32 = arith.constant 128 : i32
    %52 = vector.broadcast %c128_i32 : i32 to vector<8x128xi32>
    %53 = arith.select %51, %6, %52 : vector<8x128xi1>, vector<8x128xi32>
    %cst_24 = arith.constant dense<2147483647> : vector<8xi32>
    %54 = vector.multi_reduction <minsi>, %53, %cst_24 [1] : vector<8x128xi32> to vector<8xi32>
    %55 = vector.shape_cast %54 : vector<8xi32> to vector<8x1xi32>
    %56 = arith.index_cast %c0_i32 : i32 to index
    %c0_25 = arith.constant 0 : index
    %c0_26 = arith.constant 0 : index
    %57 = vector.load %arg9[%56, %c0_25, %c0_26] : memref<4x8x1xi32, #tpu.memory_space<vmem>>, vector<1x8x1xi32>
    %58 = vector.shape_cast %57 : vector<1x8x1xi32> to vector<8x1xi32>
    %59 = vector.shape_cast %55 : vector<8x1xi32> to vector<1x8x1xi32>
    tpu.vector_store %arg9[%56, %c0_25, %c0_26], %59 {strides = array<i32>} : memref<4x8x1xi32, #tpu.memory_space<vmem>>, vector<1x8x1xi32>,
    %c1_i32 = arith.constant 1 : i32
    %60 = vector.broadcast %55 : vector<8x1xi32> to vector<8x128xi32>
    %61 = arith.cmpi eq, %6, %60 : vector<8x128xi32>
    %62 = arith.extui %61 : vector<8x128xi1> to vector<8x128xi32>
    %63 = arith.sitofp %62 : vector<8x128xi32> to vector<8x128xf32>
    %cst_27 = arith.constant dense<0.000000e+00> : vector<8x32xf32>
    %64 = tpu.matmul %63, %0, %cst_27 {dimension_numbers = #tpu.dot_dimension_numbers<[1], [0], [0], [1], [0, 0, 1, 1], [], []>} : vector<8x128xf32>, vector<128x32xf32>, vector<8x32xf32> -> vector<8x32xf32>
    %cst_28 = arith.constant dense<0.000000e+00> : vector<8x128xf32>
    %65 = tpu.matmul %64, %1, %cst_28 {dimension_numbers = #tpu.dot_dimension_numbers<[1], [0], [0], [1], [0, 0, 1, 1], [], []>} : vector<8x32xf32>, vector<32x128xf32>, vector<8x128xf32> -> vector<8x128xf32>
    %cst_29 = arith.constant dense<0.000000e+00> : vector<8x128xf32>
    %66 = tpu.matmul %44, %2, %cst_29 {dimension_numbers = #tpu.dot_dimension_numbers<[1], [0], [0], [1], [0, 0, 1, 1], [], []>} : vector<8x32xf32>, vector<32x128xf32>, vector<8x128xf32> -> vector<8x128xf32>
    %67 = arith.addf %65, %66 : vector<8x128xf32>
    %68 = vector.broadcast %3 : vector<1x128xf32> to vector<8x128xf32>
    %69 = arith.addf %67, %68 : vector<8x128xf32>
    %70 = vector.extract_strided_slice %69 {offsets = [0, 0], sizes = [8, 32], strides = [1, 1]} : vector<8x128xf32> to vector<8x32xf32>
    %71 = arith.negf %70 : vector<8x32xf32>
    %72 = math.exp %71 : vector<8x32xf32>
    %cst_30 = arith.constant 1.000000e+00 : f32
    %73 = vector.broadcast %cst_30 : f32 to vector<8x32xf32>
    %74 = arith.addf %73, %72 : vector<8x32xf32>
    %75 = arith.divf %73, %74 : vector<8x32xf32>
    %76 = vector.extract_strided_slice %69 {offsets = [0, 32], sizes = [8, 32], strides = [1, 1]} : vector<8x128xf32> to vector<8x32xf32>
    %77 = arith.negf %76 : vector<8x32xf32>
    %78 = math.exp %77 : vector<8x32xf32>
    %cst_31 = arith.constant 1.000000e+00 : f32
    %79 = vector.broadcast %cst_31 : f32 to vector<8x32xf32>
    %80 = arith.addf %79, %78 : vector<8x32xf32>
    %81 = arith.divf %79, %80 : vector<8x32xf32>
    %82 = vector.extract_strided_slice %69 {offsets = [0, 64], sizes = [8, 32], strides = [1, 1]} : vector<8x128xf32> to vector<8x32xf32>
    %83 = math.tanh %82 : vector<8x32xf32>
    %84 = vector.extract_strided_slice %69 {offsets = [0, 96], sizes = [8, 32], strides = [1, 1]} : vector<8x128xf32> to vector<8x32xf32>
    %85 = arith.negf %84 : vector<8x32xf32>
    %86 = math.exp %85 : vector<8x32xf32>
    %cst_32 = arith.constant 1.000000e+00 : f32
    %87 = vector.broadcast %cst_32 : f32 to vector<8x32xf32>
    %88 = arith.addf %87, %86 : vector<8x32xf32>
    %89 = arith.divf %87, %88 : vector<8x32xf32>
    %90 = arith.mulf %81, %42 : vector<8x32xf32>
    %91 = arith.mulf %75, %83 : vector<8x32xf32>
    %92 = arith.addf %90, %91 : vector<8x32xf32>
    %93 = math.tanh %92 : vector<8x32xf32>
    %94 = arith.mulf %89, %93 : vector<8x32xf32>
    %cst_33 = arith.constant dense<0.000000e+00> : vector<8x128xf32>
    %95 = tpu.matmul %94, %4, %cst_33 {dimension_numbers = #tpu.dot_dimension_numbers<[1], [0], [0], [1], [0, 0, 1, 1], [], []>} : vector<8x32xf32>, vector<32x128xf32>, vector<8x128xf32> -> vector<8x128xf32>
    %96 = vector.broadcast %5 : vector<1x128xf32> to vector<8x128xf32>
    %97 = arith.addf %95, %96 : vector<8x128xf32>
    %cst_34 = arith.constant dense<0xFF800000> : vector<8xf32>
    %98 = vector.multi_reduction <maximumf>, %97, %cst_34 [1] : vector<8x128xf32> to vector<8xf32>
    %99 = vector.shape_cast %98 : vector<8xf32> to vector<8x1xf32>
    %100 = vector.broadcast %99 : vector<8x1xf32> to vector<8x128xf32>
    %101 = arith.cmpf oeq, %97, %100 : vector<8x128xf32>
    %c128_i32_35 = arith.constant 128 : i32
    %102 = vector.broadcast %c128_i32_35 : i32 to vector<8x128xi32>
    %103 = arith.select %101, %6, %102 : vector<8x128xi1>, vector<8x128xi32>
    %cst_36 = arith.constant dense<2147483647> : vector<8xi32>
    %104 = vector.multi_reduction <minsi>, %103, %cst_36 [1] : vector<8x128xi32> to vector<8xi32>
    %105 = vector.shape_cast %104 : vector<8xi32> to vector<8x1xi32>
    %106 = arith.index_cast %c1_i32 : i32 to index
    %c0_37 = arith.constant 0 : index
    %c0_38 = arith.constant 0 : index
    %107 = vector.load %arg9[%106, %c0_37, %c0_38] : memref<4x8x1xi32, #tpu.memory_space<vmem>>, vector<1x8x1xi32>
    %108 = vector.shape_cast %107 : vector<1x8x1xi32> to vector<8x1xi32>
    %109 = vector.shape_cast %105 : vector<8x1xi32> to vector<1x8x1xi32>
    tpu.vector_store %arg9[%106, %c0_37, %c0_38], %109 {strides = array<i32>} : memref<4x8x1xi32, #tpu.memory_space<vmem>>, vector<1x8x1xi32>,
    %c2_i32 = arith.constant 2 : i32
    %110 = vector.broadcast %105 : vector<8x1xi32> to vector<8x128xi32>
    %111 = arith.cmpi eq, %6, %110 : vector<8x128xi32>
    %112 = arith.extui %111 : vector<8x128xi1> to vector<8x128xi32>
    %113 = arith.sitofp %112 : vector<8x128xi32> to vector<8x128xf32>
    %cst_39 = arith.constant dense<0.000000e+00> : vector<8x32xf32>
    %114 = tpu.matmul %113, %0, %cst_39 {dimension_numbers = #tpu.dot_dimension_numbers<[1], [0], [0], [1], [0, 0, 1, 1], [], []>} : vector<8x128xf32>, vector<128x32xf32>, vector<8x32xf32> -> vector<8x32xf32>
    %cst_40 = arith.constant dense<0.000000e+00> : vector<8x128xf32>
    %115 = tpu.matmul %114, %1, %cst_40 {dimension_numbers = #tpu.dot_dimension_numbers<[1], [0], [0], [1], [0, 0, 1, 1], [], []>} : vector<8x32xf32>, vector<32x128xf32>, vector<8x128xf32> -> vector<8x128xf32>
    %cst_41 = arith.constant dense<0.000000e+00> : vector<8x128xf32>
    %116 = tpu.matmul %94, %2, %cst_41 {dimension_numbers = #tpu.dot_dimension_numbers<[1], [0], [0], [1], [0, 0, 1, 1], [], []>} : vector<8x32xf32>, vector<32x128xf32>, vector<8x128xf32> -> vector<8x128xf32>
    %117 = arith.addf %115, %116 : vector<8x128xf32>
    %118 = vector.broadcast %3 : vector<1x128xf32> to vector<8x128xf32>
    %119 = arith.addf %117, %118 : vector<8x128xf32>
    %120 = vector.extract_strided_slice %119 {offsets = [0, 0], sizes = [8, 32], strides = [1, 1]} : vector<8x128xf32> to vector<8x32xf32>
    %121 = arith.negf %120 : vector<8x32xf32>
    %122 = math.exp %121 : vector<8x32xf32>
    %cst_42 = arith.constant 1.000000e+00 : f32
    %123 = vector.broadcast %cst_42 : f32 to vector<8x32xf32>
    %124 = arith.addf %123, %122 : vector<8x32xf32>
    %125 = arith.divf %123, %124 : vector<8x32xf32>
    %126 = vector.extract_strided_slice %119 {offsets = [0, 32], sizes = [8, 32], strides = [1, 1]} : vector<8x128xf32> to vector<8x32xf32>
    %127 = arith.negf %126 : vector<8x32xf32>
    %128 = math.exp %127 : vector<8x32xf32>
    %cst_43 = arith.constant 1.000000e+00 : f32
    %129 = vector.broadcast %cst_43 : f32 to vector<8x32xf32>
    %130 = arith.addf %129, %128 : vector<8x32xf32>
    %131 = arith.divf %129, %130 : vector<8x32xf32>
    %132 = vector.extract_strided_slice %119 {offsets = [0, 64], sizes = [8, 32], strides = [1, 1]} : vector<8x128xf32> to vector<8x32xf32>
    %133 = math.tanh %132 : vector<8x32xf32>
    %134 = vector.extract_strided_slice %119 {offsets = [0, 96], sizes = [8, 32], strides = [1, 1]} : vector<8x128xf32> to vector<8x32xf32>
    %135 = arith.negf %134 : vector<8x32xf32>
    %136 = math.exp %135 : vector<8x32xf32>
    %cst_44 = arith.constant 1.000000e+00 : f32
    %137 = vector.broadcast %cst_44 : f32 to vector<8x32xf32>
    %138 = arith.addf %137, %136 : vector<8x32xf32>
    %139 = arith.divf %137, %138 : vector<8x32xf32>
    %140 = arith.mulf %131, %92 : vector<8x32xf32>
    %141 = arith.mulf %125, %133 : vector<8x32xf32>
    %142 = arith.addf %140, %141 : vector<8x32xf32>
    %143 = math.tanh %142 : vector<8x32xf32>
    %144 = arith.mulf %139, %143 : vector<8x32xf32>
    %cst_45 = arith.constant dense<0.000000e+00> : vector<8x128xf32>
    %145 = tpu.matmul %144, %4, %cst_45 {dimension_numbers = #tpu.dot_dimension_numbers<[1], [0], [0], [1], [0, 0, 1, 1], [], []>} : vector<8x32xf32>, vector<32x128xf32>, vector<8x128xf32> -> vector<8x128xf32>
    %146 = vector.broadcast %5 : vector<1x128xf32> to vector<8x128xf32>
    %147 = arith.addf %145, %146 : vector<8x128xf32>
    %cst_46 = arith.constant dense<0xFF800000> : vector<8xf32>
    %148 = vector.multi_reduction <maximumf>, %147, %cst_46 [1] : vector<8x128xf32> to vector<8xf32>
    %149 = vector.shape_cast %148 : vector<8xf32> to vector<8x1xf32>
    %150 = vector.broadcast %149 : vector<8x1xf32> to vector<8x128xf32>
    %151 = arith.cmpf oeq, %147, %150 : vector<8x128xf32>
    %c128_i32_47 = arith.constant 128 : i32
    %152 = vector.broadcast %c128_i32_47 : i32 to vector<8x128xi32>
    %153 = arith.select %151, %6, %152 : vector<8x128xi1>, vector<8x128xi32>
    %cst_48 = arith.constant dense<2147483647> : vector<8xi32>
    %154 = vector.multi_reduction <minsi>, %153, %cst_48 [1] : vector<8x128xi32> to vector<8xi32>
    %155 = vector.shape_cast %154 : vector<8xi32> to vector<8x1xi32>
    %156 = arith.index_cast %c2_i32 : i32 to index
    %c0_49 = arith.constant 0 : index
    %c0_50 = arith.constant 0 : index
    %157 = vector.load %arg9[%156, %c0_49, %c0_50] : memref<4x8x1xi32, #tpu.memory_space<vmem>>, vector<1x8x1xi32>
    %158 = vector.shape_cast %157 : vector<1x8x1xi32> to vector<8x1xi32>
    %159 = vector.shape_cast %155 : vector<8x1xi32> to vector<1x8x1xi32>
    tpu.vector_store %arg9[%156, %c0_49, %c0_50], %159 {strides = array<i32>} : memref<4x8x1xi32, #tpu.memory_space<vmem>>, vector<1x8x1xi32>,
    %c3_i32 = arith.constant 3 : i32
    %160 = vector.broadcast %155 : vector<8x1xi32> to vector<8x128xi32>
    %161 = arith.cmpi eq, %6, %160 : vector<8x128xi32>
    %162 = arith.extui %161 : vector<8x128xi1> to vector<8x128xi32>
    %163 = arith.sitofp %162 : vector<8x128xi32> to vector<8x128xf32>
    %cst_51 = arith.constant dense<0.000000e+00> : vector<8x32xf32>
    %164 = tpu.matmul %163, %0, %cst_51 {dimension_numbers = #tpu.dot_dimension_numbers<[1], [0], [0], [1], [0, 0, 1, 1], [], []>} : vector<8x128xf32>, vector<128x32xf32>, vector<8x32xf32> -> vector<8x32xf32>
    %cst_52 = arith.constant dense<0.000000e+00> : vector<8x128xf32>
    %165 = tpu.matmul %164, %1, %cst_52 {dimension_numbers = #tpu.dot_dimension_numbers<[1], [0], [0], [1], [0, 0, 1, 1], [], []>} : vector<8x32xf32>, vector<32x128xf32>, vector<8x128xf32> -> vector<8x128xf32>
    %cst_53 = arith.constant dense<0.000000e+00> : vector<8x128xf32>
    %166 = tpu.matmul %144, %2, %cst_53 {dimension_numbers = #tpu.dot_dimension_numbers<[1], [0], [0], [1], [0, 0, 1, 1], [], []>} : vector<8x32xf32>, vector<32x128xf32>, vector<8x128xf32> -> vector<8x128xf32>
    %167 = arith.addf %165, %166 : vector<8x128xf32>
    %168 = vector.broadcast %3 : vector<1x128xf32> to vector<8x128xf32>
    %169 = arith.addf %167, %168 : vector<8x128xf32>
    %170 = vector.extract_strided_slice %169 {offsets = [0, 0], sizes = [8, 32], strides = [1, 1]} : vector<8x128xf32> to vector<8x32xf32>
    %171 = arith.negf %170 : vector<8x32xf32>
    %172 = math.exp %171 : vector<8x32xf32>
    %cst_54 = arith.constant 1.000000e+00 : f32
    %173 = vector.broadcast %cst_54 : f32 to vector<8x32xf32>
    %174 = arith.addf %173, %172 : vector<8x32xf32>
    %175 = arith.divf %173, %174 : vector<8x32xf32>
    %176 = vector.extract_strided_slice %169 {offsets = [0, 32], sizes = [8, 32], strides = [1, 1]} : vector<8x128xf32> to vector<8x32xf32>
    %177 = arith.negf %176 : vector<8x32xf32>
    %178 = math.exp %177 : vector<8x32xf32>
    %cst_55 = arith.constant 1.000000e+00 : f32
    %179 = vector.broadcast %cst_55 : f32 to vector<8x32xf32>
    %180 = arith.addf %179, %178 : vector<8x32xf32>
    %181 = arith.divf %179, %180 : vector<8x32xf32>
    %182 = vector.extract_strided_slice %169 {offsets = [0, 64], sizes = [8, 32], strides = [1, 1]} : vector<8x128xf32> to vector<8x32xf32>
    %183 = math.tanh %182 : vector<8x32xf32>
    %184 = vector.extract_strided_slice %169 {offsets = [0, 96], sizes = [8, 32], strides = [1, 1]} : vector<8x128xf32> to vector<8x32xf32>
    %185 = arith.negf %184 : vector<8x32xf32>
    %186 = math.exp %185 : vector<8x32xf32>
    %cst_56 = arith.constant 1.000000e+00 : f32
    %187 = vector.broadcast %cst_56 : f32 to vector<8x32xf32>
    %188 = arith.addf %187, %186 : vector<8x32xf32>
    %189 = arith.divf %187, %188 : vector<8x32xf32>
    %190 = arith.mulf %181, %142 : vector<8x32xf32>
    %191 = arith.mulf %175, %183 : vector<8x32xf32>
    %192 = arith.addf %190, %191 : vector<8x32xf32>
    %193 = math.tanh %192 : vector<8x32xf32>
    %194 = arith.mulf %189, %193 : vector<8x32xf32>
    %cst_57 = arith.constant dense<0.000000e+00> : vector<8x128xf32>
    %195 = tpu.matmul %194, %4, %cst_57 {dimension_numbers = #tpu.dot_dimension_numbers<[1], [0], [0], [1], [0, 0, 1, 1], [], []>} : vector<8x32xf32>, vector<32x128xf32>, vector<8x128xf32> -> vector<8x128xf32>
    %196 = vector.broadcast %5 : vector<1x128xf32> to vector<8x128xf32>
    %197 = arith.addf %195, %196 : vector<8x128xf32>
    %cst_58 = arith.constant dense<0xFF800000> : vector<8xf32>
    %198 = vector.multi_reduction <maximumf>, %197, %cst_58 [1] : vector<8x128xf32> to vector<8xf32>
    %199 = vector.shape_cast %198 : vector<8xf32> to vector<8x1xf32>
    %200 = vector.broadcast %199 : vector<8x1xf32> to vector<8x128xf32>
    %201 = arith.cmpf oeq, %197, %200 : vector<8x128xf32>
    %c128_i32_59 = arith.constant 128 : i32
    %202 = vector.broadcast %c128_i32_59 : i32 to vector<8x128xi32>
    %203 = arith.select %201, %6, %202 : vector<8x128xi1>, vector<8x128xi32>
    %cst_60 = arith.constant dense<2147483647> : vector<8xi32>
    %204 = vector.multi_reduction <minsi>, %203, %cst_60 [1] : vector<8x128xi32> to vector<8xi32>
    %205 = vector.shape_cast %204 : vector<8xi32> to vector<8x1xi32>
    %206 = arith.index_cast %c3_i32 : i32 to index
    %c0_61 = arith.constant 0 : index
    %c0_62 = arith.constant 0 : index
    %207 = vector.load %arg9[%206, %c0_61, %c0_62] : memref<4x8x1xi32, #tpu.memory_space<vmem>>, vector<1x8x1xi32>
    %208 = vector.shape_cast %207 : vector<1x8x1xi32> to vector<8x1xi32>
    %209 = vector.shape_cast %205 : vector<8x1xi32> to vector<1x8x1xi32>
    tpu.vector_store %arg9[%206, %c0_61, %c0_62], %209 {strides = array<i32>} : memref<4x8x1xi32, #tpu.memory_space<vmem>>, vector<1x8x1xi32>,
    %c4_i32 = arith.constant 4 : i32
    return
  }
}

</mosaic_0001>

<bundles_post_ra>
// kernel: seq2seq_forward.2
= control target key start
LH: loop header
LB: loop body
LE: loop exit
PB: predicated region body
PF: predicated region fallthrough
CT: control target
= control target key end

     0   :  { %v1026_v2 = vmov 0.0|0.0   ;;  %vm36_vm0 = vcmask 261120   ;;  %vm1027_vm1 = vmmov 0   ;;  %v1028_v4 = vmov 0.0   ;;  %s1029_s13 = smov 64   ;;  %s1205_s1 = inlined_call_operand.vmem [shape: f32[32,128], index: 1, kind: input, shape index: {}]   ;;  %s1206_s2 = inlined_call_operand.vmem [shape: f32[32,128], index: 2, kind: input, shape index: {}]   ;;  %s1207_s0 = inlined_call_operand.vmem [shape: f32[48,32], index: 0, kind: input, shape index: {}]   ;;  %s1208_s3 = inlined_call_operand.vmem [shape: f32[1,128], index: 3, kind: input, shape index: {}]   ;;  %s1209_s5 = inlined_call_operand.vmem [shape: f32[8,32], index: 5, kind: output, shape index: {1}]   ;;  %s1210_s4 = inlined_call_operand.vmem [shape: f32[8,32], index: 4, kind: output, shape index: {0}]  }
   0x1   :  { %v25_v0 = vld [vmem:[%s1205_s1] sm:$0xff]  ;;  %v26_v1 = vld [vmem:[%s1205_s1 + $0x8] sm:$0xff]  ;;  %936 = vmatprep.subr.bf16.mxu1 %v1026_v2  ;;  %870 = vmatprep.mubr.msk.f32.mxu1 %vm1027_vm1, %v1028_v4  ;;  %v27_v7 = vld [vmem:[%s1205_s1 + $0x10] sm:$0xff] }
   0x2   :  { %v156_v3 = vld [vmem:[%s1206_s2] sm:$0xff]  ;;  %v928_v5 = vpack.c.bf16 %v26_v1, %v25_v0  ;;  %v157_v6 = vld [vmem:[%s1206_s2 + $0x8] sm:$0xff]  ;;  %v28_v8 = vld [vmem:[%s1205_s1 + $0x18] sm:$0xff] }
   0x3   :  { %v1083_v9 = vpack.c.bf16 %v157_v6, %v156_v3  ;;  %v932_v10 = vpack.c.bf16 %v28_v8, %v27_v7  ;;  %v19_v11 = vld [vmem:[%s1207_s0] sm:$0xff]  ;;  %v158_v12 = vld [vmem:[%s1206_s2 + $0x10] sm:$0xff]  ;;  %v159_v13 = vld [vmem:[%s1206_s2 + $0x18] sm:$0xff] }
   0x4   :  { %929 = vmatprep.subr.bf16.mxu0 %v928_v5  ;;  %853 = vmatprep.mubr.msk.f32.mxu0 %vm36_vm0, %v19_v11  ;;  %v1096_v14 = vpack.c.bf16 %v159_v13, %v158_v12  ;;  %v20_v15 = vld [vmem:[%s1207_s0 + $0x8] sm:$0xff]  ;;  %v1120_v16 = vld [vmem:[%s1208_s3] ss:$0 sm:$0xff]  ;;  %s1030_s3 = smov 32   ;;  %v21_v51 = vld [vmem:[%s1207_s0 + $0x10] sm:$0xff] }
   0x5   :  { %931 = vmatpush3.bf16.msra.mxu0 %v928_v5  ;;  %938 = vmatpush3.bf16.msra.mxu1 %v1083_v9  ;;  %v22_v52 = vld [vmem:[%s1207_s0 + $0x18] sm:$0xff]  ;;  %v23_v53 = vld [vmem:[%s1207_s0 + $0x20] sm:$0xff]  ;;  %v24_v54 = vld [vmem:[%s1207_s0 + $0x28] sm:$0xff]  ;;  %s1031_s0 = smov 96  }
   0x6   :  { %933 = vmatprep.subr.bf16.mxu0 %v932_v10  ;;  %939 = vmatprep.subr.bf16.mxu1 %v1026_v2 }
   0x9   :  { %935 = vmatpush3.bf16.msra.mxu0 %v932_v10  ;;  %941 = vmatpush3.bf16.msra.mxu1 %v1096_v14 }
   0xa   :  { %942 = vmatprep.subr.bf16.mxu1 %v1026_v2  ;;  %948 = vmatprep.subr.bf16.mxu0 %v1026_v2 }
   0xc   :  { %854 = vmatmul.mubr.msk.f32.vlgmr.msra.gmra.mrb[0].mxu0 %vm36_vm0, %v20_v15  ;;  %871 = vmatmul.mubr.f32.vlgmr.msra.gmra.mrb[0].mxu1 %v1028_v4 }
   0xd   :  { %944 = vmatpush3.bf16.msra.mxu1 %v1083_v9  ;;  %881 = vmatprep.mubr.msk.f32.mxu1 %vm1027_vm1, %v1028_v4 }
   0xe   :  { %945 = vmatprep.subr.bf16.mxu1 %v1026_v2  ;;  %950 = vmatpush3.bf16.msra.mxu0 %v1083_v9 }
   0xf   :  { %951 = vmatprep.subr.bf16.mxu0 %v1026_v2  ;;  %856 = vmatprep.mubr.msk.f32.mxu0 %vm36_vm0, %v21_v51 }
  0x10   :  { %857 = vmatmul.mubr.msk.f32.gmra.mrb[2].mxu0 %vm36_vm0, %v22_v52 }
  0x11   :  { %947 = vmatpush3.bf16.msra.mxu1 %v1096_v14  ;;  %859 = vmatprep.mubr.msk.f32.mxu0 %vm36_vm0, %v23_v53 }
  0x12   :  { %953 = vmatpush3.bf16.msra.mxu0 %v1096_v14  ;;  %954 = vmatprep.subr.bf16.mxu1 %v1026_v2 }
  0x13   :  { %960 = vmatprep.subr.bf16.mxu0 %v1026_v2 }
  0x14   :  { %860 = vmatmul.mubr.msk.f32.gmra.mrb[4].mxu0 %vm36_vm0, %v24_v54 }
  0x15   :  { %892 = vmatprep.mubr.msk.f32.mxu0 %vm1027_vm1, %v1028_v4 }
  0xdf   :  { %v855_v17 = vpop.f32.mrb[0].mxu0  ;;  %v230_v18 = vpop.f32.mrb[0].mxu1 }
  0xe0   :  { %v121_v19 = vpop.f32.mrb[1].mxu0  ;;  %v872_v20 = vpop.f32.mrb[1].mxu1  ;;  %v127_v37 = vadd.f32 %v855_v17, %v1120_v16 }
  0xe1   :  { %v122_v21 = vadd.f32 %v1120_v16, %v121_v19 }
  0xe3   :  { %v234_v22 = vadd.f32 %v230_v18, %v122_v21  ;;  %v858_v58 = vpop.f32.mrb[2].mxu0 }
  0xe4   :  { %v131_v59 = vpop.f32.mrb[3].mxu0 }
  0xe5   :  { %978 = vtanh.f32 %v234_v22  ;;  %v794_v24 = vmul.f32 -1.442695, %v234_v22  ;;  %v132_v63 = vadd.f32 %v1120_v16, %v131_v59  ;;  %v137_v22 = vadd.f32 %v858_v58, %v1120_v16 }
  0xe7   :  { %980 = vpow2.f32 %v794_v24  ;;  %v1157_v60 = vpop.f32.mrb[4].mxu0 }
  0xe8   :  { %v1159_v61 = vpop.f32.mrb[5].mxu0  ;;  %v147_v54 = vadd.f32 %v1157_v60, %v1120_v16 }
  0xef   :  { %v979_v23 = vpop.eup %978 }
  0xf0   :  { %244 = vrot.lane.b32.xlu0 %v979_v23, %s1029_s13 }
  0xf1   :  { %v981_v25 = vpop.eup %980 }
  0xf2   :  { %v238_v26 = vadd.f32 1.0, %v981_v25 }
  0xf4   :  { %982 = vrcp.f32 %v238_v26 }
  0xfe   :  { %v983_v27 = vpop.eup %982 }
  0xff   :  { %v242_v30 = vmul.f32 0.0, %v983_v27 }
 0x162   :  { %v245_v28 = vpop.permute.xlu0 %244 }
 0x163   :  { %v247_v29 = vmul.f32 %v983_v27, %v245_v28 }
 0x165   :  { %249 = vrot.lane.b32.xlu0 %v247_v29, %s1030_s3 }
 0x1d7   :  { %v250_v31 = vpop.permute.xlu0 %249 }
 0x1d8   :  { %v252_v32 = vadd.f32 %v250_v31, %v242_v30 }
 0x1da   :  { %984 = vtanh.f32 %v252_v32 }
 0x1e4   :  { %v985_v33 = vpop.eup %984 }
 0x1e5   :  { %255 = vrot.lane.b32.xlu1 %v985_v33, %s1029_s13 }
 0x257   :  { %v256_v34 = vpop.permute.xlu1 %255 }
 0x258   :  { %v258_v35 = vmul.f32 %v983_v27, %v256_v34 }
 0x25a   :  { %262 = vrot.lane.b32.xlu1 %v258_v35, %s1030_s3 }
 0x2cc   :  { %v263_v36 = vpop.permute.xlu1 %262 }
 0x2cd   :  { %882 = vmatmul.mubr.msk.f32.vlgmr.msra.gmra.mrb[2].mxu1 %vm36_vm0, %v263_v36  ;;  %v142_v36 = vadd.f32 %v1120_v16, %v1159_v61 }
 0x2ce   :  { %956 = vmatpush3.bf16.msra.mxu1 %v1083_v9  ;;  %903 = vmatprep.mubr.msk.f32.mxu1 %vm1027_vm1, %v1028_v4 }
 0x2cf   :  { %957 = vmatprep.subr.bf16.mxu1 %v1026_v2 }
 0x2d2   :  { %959 = vmatpush3.bf16.msra.mxu1 %v1096_v14 }
 0x2d3   :  { %966 = vmatprep.subr.bf16.mxu1 %v1026_v2 }
 0x3a0   :  { %v332_v38 = vpop.f32.mrb[2].mxu1 }
 0x3a1   :  { %v336_v39 = vadd.f32 %v332_v38, %v127_v37  ;;  %v883_v40 = vpop.f32.mrb[3].mxu1 }
 0x3a3   :  { %986 = vtanh.f32 %v336_v39  ;;  %v796_v42 = vmul.f32 -1.442695, %v336_v39 }
 0x3a5   :  { %988 = vpow2.f32 %v796_v42 }
 0x3ad   :  { %v987_v41 = vpop.eup %986 }
 0x3ae   :  { %346 = vrot.lane.b32.xlu0 %v987_v41, %s1029_s13 }
 0x3af   :  { %v989_v43 = vpop.eup %988 }
 0x3b0   :  { %v340_v44 = vadd.f32 1.0, %v989_v43 }
 0x3b2   :  { %990 = vrcp.f32 %v340_v44 }
 0x3bc   :  { %v991_v45 = vpop.eup %990 }
 0x3bd   :  { %v344_v48 = vmul.f32 %v991_v45, %v252_v32 }
 0x420   :  { %v347_v46 = vpop.permute.xlu0 %346 }
 0x421   :  { %v349_v47 = vmul.f32 %v991_v45, %v347_v46 }
 0x423   :  { %351 = vrot.lane.b32.xlu1 %v349_v47, %s1030_s3 }
 0x495   :  { %v352_v49 = vpop.permute.xlu1 %351 }
 0x496   :  { %v354_v50 = vadd.f32 %v352_v49, %v344_v48 }
 0x498   :  { %992 = vtanh.f32 %v354_v50 }
 0x4a2   :  { %v993_v55 = vpop.eup %992 }
 0x4a3   :  { %357 = vrot.lane.b32.xlu0 %v993_v55, %s1029_s13 }
 0x515   :  { %v358_v56 = vpop.permute.xlu0 %357 }
 0x516   :  { %v360_v57 = vmul.f32 %v991_v45, %v358_v56 }
 0x518   :  { %364 = vrot.lane.b32.xlu1 %v360_v57, %s1030_s3 }
 0x58a   :  { %v365_v62 = vpop.permute.xlu1 %364 }
 0x58b   :  { %893 = vmatmul.mubr.msk.f32.vlgmr.msra.gmra.mrb[6].mxu0 %vm36_vm0, %v365_v62 }
 0x58c   :  { %962 = vmatpush3.bf16.msra.mxu0 %v1083_v9  ;;  %914 = vmatprep.mubr.msk.f32.mxu0 %vm1027_vm1, %v1028_v4 }
 0x58d   :  { %963 = vmatprep.subr.bf16.mxu0 %v1026_v2 }
 0x590   :  { %965 = vmatpush3.bf16.msra.mxu0 %v1096_v14 }
 0x65e   :  { %v434_v0 = vpop.f32.mrb[6].mxu0 }
 0x65f   :  { %v438_v1 = vadd.f32 %v434_v0, %v132_v63  ;;  %v894_v3 = vpop.f32.mrb[7].mxu0 }
 0x661   :  { %994 = vtanh.f32 %v438_v1  ;;  %v798_v6 = vmul.f32 -1.442695, %v438_v1 }
 0x663   :  { %996 = vpow2.f32 %v798_v6 }
 0x66b   :  { %v995_v5 = vpop.eup %994 }
 0x66c   :  { %448 = vrot.lane.b32.xlu0 %v995_v5, %s1029_s13 }
 0x66d   :  { %v997_v7 = vpop.eup %996 }
 0x66e   :  { %v442_v8 = vadd.f32 1.0, %v997_v7 }
 0x670   :  { %998 = vrcp.f32 %v442_v8 }
 0x67a   :  { %v999_v10 = vpop.eup %998 }
 0x67b   :  { %v446_v13 = vmul.f32 %v999_v10, %v354_v50 }
 0x6de   :  { %v449_v11 = vpop.permute.xlu0 %448 }
 0x6df   :  { %v451_v12 = vmul.f32 %v999_v10, %v449_v11 }
 0x6e1   :  { %453 = vrot.lane.b32.xlu1 %v451_v12, %s1030_s3 }
 0x753   :  { %v454_v15 = vpop.permute.xlu1 %453 }
 0x754   :  { %v456_v17 = vadd.f32 %v454_v15, %v446_v13 }
 0x756   :  { %1000 = vtanh.f32 %v456_v17 }
 0x760   :  { %v1001_v18 = vpop.eup %1000 }
 0x761   :  { %459 = vrot.lane.b32.xlu0 %v1001_v18, %s1029_s13 }
 0x7d3   :  { %v460_v19 = vpop.permute.xlu0 %459 }
 0x7d4   :  { %v462_v20 = vmul.f32 %v999_v10, %v460_v19 }
 0x7d6   :  { %466 = vrot.lane.b32.xlu1 %v462_v20, %s1030_s3 }
 0x848   :  { %v467_v21 = vpop.permute.xlu1 %466 }
 0x849   :  { %904 = vmatmul.mubr.msk.f32.vlgmr.msra.gmra.mrb[4].mxu1 %vm36_vm0, %v467_v21 }
 0x84a   :  { %968 = vmatpush3.bf16.msra.mxu1 %v1083_v9  ;;  %925 = vmatprep.mubr.msk.f32.mxu1 %vm1027_vm1, %v1028_v4 }
 0x84b   :  { %969 = vmatprep.subr.bf16.mxu1 %v1026_v2 }
 0x84e   :  { %971 = vmatpush3.bf16.msra.mxu1 %v1096_v14 }
 0x91c   :  { %v536_v23 = vpop.f32.mrb[4].mxu1 }
 0x91d   :  { %v540_v24 = vadd.f32 %v536_v23, %v137_v22  ;;  %v905_v25 = vpop.f32.mrb[5].mxu1 }
 0x91f   :  { %1002 = vtanh.f32 %v540_v24  ;;  %v800_v27 = vmul.f32 -1.442695, %v540_v24 }
 0x921   :  { %1004 = vpow2.f32 %v800_v27 }
 0x929   :  { %v1003_v26 = vpop.eup %1002 }
 0x92a   :  { %550 = vrot.lane.b32.xlu0 %v1003_v26, %s1029_s13 }
 0x92b   :  { %v1005_v28 = vpop.eup %1004 }
 0x92c   :  { %v544_v9 = vadd.f32 1.0, %v1005_v28 }
 0x92e   :  { %1006 = vrcp.f32 %v544_v9 }
 0x938   :  { %v1007_v29 = vpop.eup %1006 }
 0x939   :  { %v548_v2 = vmul.f32 %v1007_v29, %v456_v17 }
 0x99c   :  { %v551_v4 = vpop.permute.xlu0 %550 }
 0x99d   :  { %v553_v30 = vmul.f32 %v1007_v29, %v551_v4 }
 0x99f   :  { %555 = vrot.lane.b32.xlu1 %v553_v30, %s1030_s3 }
 0xa11   :  { %v556_v14 = vpop.permute.xlu1 %555 }
 0xa12   :  { %v558_v31 = vadd.f32 %v556_v14, %v548_v2 }
 0xa14   :  { %1008 = vtanh.f32 %v558_v31 }
 0xa1e   :  { %v1009_v32 = vpop.eup %1008 }
 0xa1f   :  { %561 = vrot.lane.b32.xlu0 %v1009_v32, %s1029_s13 }
 0xa91   :  { %v562_v33 = vpop.permute.xlu0 %561 }
 0xa92   :  { %v564_v34 = vmul.f32 %v1007_v29, %v562_v33 }
 0xa94   :  { %568 = vrot.lane.b32.xlu1 %v564_v34, %s1030_s3 }
 0xb06   :  { %v569_v35 = vpop.permute.xlu1 %568 }
 0xb07   :  { %915 = vmatmul.mubr.msk.f32.vlgmr.msra.gmra.mrb[8].mxu0 %vm36_vm0, %v569_v35 }
 0xbda   :  { %v638_v37 = vpop.f32.mrb[8].mxu0 }
 0xbdb   :  { %v642_v38 = vadd.f32 %v638_v37, %v142_v36  ;;  %v916_v39 = vpop.f32.mrb[9].mxu0 }
 0xbdd   :  { %1010 = vtanh.f32 %v642_v38  ;;  %v802_v41 = vmul.f32 -1.442695, %v642_v38 }
 0xbdf   :  { %1012 = vpow2.f32 %v802_v41 }
 0xbe7   :  { %v1011_v40 = vpop.eup %1010 }
 0xbe8   :  { %652 = vrot.lane.b32.xlu0 %v1011_v40, %s1029_s13 }
 0xbe9   :  { %v1013_v42 = vpop.eup %1012 }
 0xbea   :  { %v646_v43 = vadd.f32 1.0, %v1013_v42 }
 0xbec   :  { %1014 = vrcp.f32 %v646_v43 }
 0xbf6   :  { %v1015_v44 = vpop.eup %1014 }
 0xbf7   :  { %v650_v47 = vmul.f32 %v1015_v44, %v558_v31 }
 0xc5a   :  { %v653_v45 = vpop.permute.xlu0 %652 }
 0xc5b   :  { %v655_v46 = vmul.f32 %v1015_v44, %v653_v45 }
 0xc5d   :  { %657 = vrot.lane.b32.xlu1 %v655_v46, %s1030_s3 }
 0xccf   :  { %v658_v48 = vpop.permute.xlu1 %657 }
 0xcd0   :  { %v660_v49 = vadd.f32 %v658_v48, %v650_v47 }
 0xcd2   :  { %1016 = vtanh.f32 %v660_v49 }
 0xcdc   :  { %v1017_v50 = vpop.eup %1016 }
 0xcdd   :  { %663 = vrot.lane.b32.xlu0 %v1017_v50, %s1029_s13 }
 0xd4f   :  { %v664_v51 = vpop.permute.xlu0 %663 }
 0xd50   :  { %v666_v52 = vmul.f32 %v1015_v44, %v664_v51 }
 0xd52   :  { %670 = vrot.lane.b32.xlu1 %v666_v52, %s1030_s3 }
 0xdc4   :  { %v671_v53 = vpop.permute.xlu1 %670 }
 0xdc5   :  { %926 = vmatmul.mubr.msk.f32.vlgmr.msra.gmra.mrb[6].mxu1 %vm36_vm0, %v671_v53 }
 0xe98   :  { %v740_v55 = vpop.f32.mrb[6].mxu1 }
 0xe99   :  { %v744_v56 = vadd.f32 %v740_v55, %v147_v54  ;;  %v927_v57 = vpop.f32.mrb[7].mxu1 }
 0xe9b   :  { %1018 = vtanh.f32 %v744_v56  ;;  %v804_v59 = vmul.f32 -1.442695, %v744_v56 }
 0xe9d   :  { %1020 = vpow2.f32 %v804_v59 }
 0xea5   :  { %v1019_v58 = vpop.eup %1018 }
 0xea6   :  { %754 = vrot.lane.b32.xlu0 %v1019_v58, %s1029_s13 }
 0xea7   :  { %v1021_v61 = vpop.eup %1020 }
 0xea8   :  { %v748_v62 = vadd.f32 1.0, %v1021_v61 }
 0xeaa   :  { %1022 = vrcp.f32 %v748_v62 }
 0xeb4   :  { %v1023_v63 = vpop.eup %1022 }
 0xeb5   :  { %v752_v3 = vmul.f32 %v1023_v63, %v660_v49 }
 0xf18   :  { %v755_v0 = vpop.permute.xlu0 %754 }
 0xf19   :  { %v757_v1 = vmul.f32 %v1023_v63, %v755_v0 }
 0xf1b   :  { %759 = vrot.lane.b32.xlu1 %v757_v1, %s1030_s3 }
 0xf8d   :  { %v760_v5 = vpop.permute.xlu1 %759 }
 0xf8e   :  { %v762_v16 = vadd.f32 %v760_v5, %v752_v3 }
 0xf90   :  { %1024 = vtanh.f32 %v762_v16 }
 0xf9a   :  { %v1025_v60 = vpop.eup %1024 }
 0xf9b   :  { %765 = vrot.lane.b32.xlu0 %v1025_v60, %s1029_s13 }
 0xf9f   :  { %775 = vrot.lane.b32.xlu0 %v762_v16, %s1031_s0 }
0x100d   :  { %v766_v6 = vpop.permute.xlu0 %765 }
0x100e   :  { %v768_v7 = vmul.f32 %v1023_v63, %v766_v6 }
0x1010   :  { %770 = vrot.lane.b32.xlu1 %v768_v7, %s1030_s3 }
0x1011   :  { %v776_v8 = vpop.permute.xlu0 %775 }
0x1012   :  { %778 = vst.msk [vmem:[%s1209_s5] sm:$0xff] %vm36_vm0, %v776_v8 }
0x1082   :  { %v771_v10 = vpop.permute.xlu1 %770 }
0x1083   :  { %773 = vst.msk [vmem:[%s1210_s4] sm:$0xff] %vm36_vm0, %v771_v10 }

// kernel: seq2seq_forward.3
= control target key start
LH: loop header
LB: loop body
LE: loop exit
PB: predicated region body
PF: predicated region fallthrough
CT: control target
= control target key end

     0   :  { %v2075_v0 = vmov 0   ;;  %v2076_v2 = vmov 0.0|0.0   ;;  %vm2077_vm0 = vmmov 0   ;;  %v2078_v8 = vmov 0.0   ;;  %s2080_s14 = smov 32   ;;  %s2486_s0 = inlined_call_operand.vmem [shape: s32[8,1], index: 0, kind: input, shape index: {}]   ;;  %s2487_s1 = inlined_call_operand.vmem [shape: f32[128,32], index: 1, kind: input, shape index: {}]   ;;  %s2488_s3 = inlined_call_operand.vmem [shape: f32[32,128], index: 3, kind: input, shape index: {}]   ;;  %s2489_s2 = inlined_call_operand.vmem [shape: f32[32,128], index: 2, kind: input, shape index: {}]   ;;  %s2490_s7 = inlined_call_operand.vmem [shape: f32[8,32], index: 7, kind: input, shape index: {}]   ;;  %s2491_s8 = inlined_call_operand.vmem [shape: f32[8,32], index: 8, kind: input, shape index: {}]   ;;  %s2492_s4 = inlined_call_operand.vmem [shape: f32[1,128], index: 4, kind: input, shape index: {}]   ;;  %s2493_s5 = inlined_call_operand.vmem [shape: f32[32,128], index: 5, kind: input, shape index: {}]   ;;  %s2494_s6 = inlined_call_operand.vmem [shape: f32[1,128], index: 6, kind: input, shape index: {}]   ;;  %s2495_s9 = inlined_call_operand.vmem [shape: s32[4,8,1], index: 9, kind: output, shape index: {}]  }
   0x1   :  { %2042 = vset.pattern.permute.xlu0 %v2075_v0  ;;  %v64_v1 = vld [vmem:[%s2486_s0] sm:$0xff]  ;;  %1867 = vmatprep.subr.bf16.mxu0 %v2076_v2  ;;  %v33_v4 = vld [vmem:[%s2487_s1 + $0x8] sm:$0xff]  ;;  %v34_v6 = vld [vmem:[%s2487_s1 + $0x10] sm:$0xff]  ;;  %vm143_vm1 = vcmask 261120   ;;  %v62_v41 = vlaneseq  ;;  %v2079_v44 = vmov 1.0   ;;  %vm424_vm5 = vcmask 7168  }
   0x2   :  { %v32_v3 = vld [vmem:[%s2487_s1] sm:$0xff]  ;;  %68 = vperm.xlu0 %2042, %v64_v1   ;;  %v35_v7 = vld [vmem:[%s2487_s1 + $0x18] sm:$0xff]  ;;  %1627 = vmatprep.mubr.msk.f32.mxu0 %vm2077_vm0, %v2078_v8  ;;  %v37_v11 = vld [vmem:[%s2487_s1 + $0x28] sm:$0xff] }
   0x3   :  { %v2142_v5 = vpack.c.bf16 %v33_v4, %v32_v3  ;;  %1891 = vmatprep.subr.bf16.mxu1 %v2076_v2  ;;  %1638 = vmatprep.mubr.msk.f32.mxu1 %vm2077_vm0, %v2078_v8  ;;  %v2156_v9 = vpack.c.bf16 %v35_v7, %v34_v6  ;;  %v36_v10 = vld [vmem:[%s2487_s1 + $0x20] sm:$0xff]  ;;  %v53_v13 = vld [vmem:[%s2488_s3 + $0x8] sm:$0xff]  ;;  %v54_v14 = vld [vmem:[%s2488_s3 + $0x10] sm:$0xff]  ;;  %v2267_v42 = vand.u32 127, %v62_v41 }
   0x4   :  { %v52_v12 = vld [vmem:[%s2488_s3] sm:$0xff]  ;;  %v55_v15 = vld [vmem:[%s2488_s3 + $0x18] sm:$0xff]  ;;  %v2178_v16 = vpack.c.bf16 %v37_v11, %v36_v10  ;;  %v38_v18 = vld [vmem:[%s2487_s1 + $0x30] sm:$0xff] }
   0x5   :  { %1869 = vmatpush3.bf16.msra.mxu0 %v2142_v5  ;;  %v2180_v17 = vpack.c.bf16 %v53_v13, %v52_v12  ;;  %v39_v19 = vld [vmem:[%s2487_s1 + $0x38] sm:$0xff]  ;;  %v2190_v20 = vpack.c.bf16 %v55_v15, %v54_v14  ;;  %v48_v21 = vld [vmem:[%s2489_s2] sm:$0xff]  ;;  %v49_v22 = vld [vmem:[%s2489_s2 + $0x8] sm:$0xff] }
   0x6   :  { %1870 = vmatprep.subr.bf16.mxu0 %v2076_v2  ;;  %v2200_v23 = vpack.c.bf16 %v39_v19, %v38_v18  ;;  %v40_v24 = vld [vmem:[%s2487_s1 + $0x40] sm:$0xff]  ;;  %v41_v25 = vld [vmem:[%s2487_s1 + $0x48] sm:$0xff]  ;;  %v2213_v27 = vpack.c.bf16 %v49_v22, %v48_v21  ;;  %v50_v28 = vld [vmem:[%s2489_s2 + $0x10] sm:$0xff] }
   0x7   :  { %1893 = vmatpush3.bf16.msra.mxu1 %v2180_v17  ;;  %v65_v26 = vld [vmem:[%s2490_s7] sm:$0xff]  ;;  %v51_v29 = vld [vmem:[%s2489_s2 + $0x18] sm:$0xff]  ;;  %v2223_v30 = vpack.c.bf16 %v41_v25, %v40_v24  ;;  %v42_v31 = vld [vmem:[%s2487_s1 + $0x50] sm:$0xff] }
   0x8   :  { %1894 = vmatprep.subr.bf16.mxu1 %v2076_v2  ;;  %v43_v32 = vld [vmem:[%s2487_s1 + $0x58] sm:$0xff]  ;;  %v2234_v33 = vpack.c.bf16 %v51_v29, %v50_v28  ;;  %v44_v35 = vld [vmem:[%s2487_s1 + $0x60] sm:$0xff]  ;;  %v45_v36 = vld [vmem:[%s2487_s1 + $0x68] sm:$0xff] }
   0x9   :  { %1872 = vmatpush3.bf16.msra.mxu0 %v2156_v9  ;;  %v2240_v34 = vpack.c.bf16 %v43_v32, %v42_v31  ;;  %v2252_v37 = vpack.c.bf16 %v45_v36, %v44_v35  ;;  %v46_v38 = vld [vmem:[%s2487_s1 + $0x70] sm:$0xff]  ;;  %v47_v39 = vld [vmem:[%s2487_s1 + $0x78] sm:$0xff]  ;;  %v66_v45 = vld [vmem:[%s2491_s8] sm:$0xff]  ;;  %s2081_s8 = smov 64  }
   0xa   :  { %1873 = vmatprep.subr.bf16.mxu0 %v2076_v2  ;;  %v2262_v40 = vpack.c.bf16 %v47_v39, %v46_v38  ;;  %305 = vrot.lane.b32.xlu1 %v66_v45, %s2080_s14  ;;  %v2287_v50 = vld [vmem:[%s2492_s4] ss:$0 sm:$0xff]  ;;  %v58_v4 = vld [vmem:[%s2493_s5 + $0x8] sm:$0xff]  ;;  %v59_v6 = vld [vmem:[%s2493_s5 + $0x10] sm:$0xff] }
   0xb   :  { %1896 = vmatpush3.bf16.msra.mxu1 %v2190_v20  ;;  %v57_v3 = vld [vmem:[%s2493_s5] sm:$0xff]  ;;  %v60_v10 = vld [vmem:[%s2493_s5 + $0x18] sm:$0xff] }
   0xc   :  { %1897 = vmatprep.subr.bf16.mxu1 %v2076_v2  ;;  %v2304_v7 = vpack.c.bf16 %v58_v4, %v57_v3  ;;  %v2310_v11 = vpack.c.bf16 %v60_v10, %v59_v6  ;;  %v2346_v18 = vld [vmem:[%s2494_s6] ss:$0 sm:$0xff] }
   0xd   :  { %1875 = vmatpush3.bf16.msra.mxu0 %v2178_v16 }
   0xe   :  { %1876 = vmatprep.subr.bf16.mxu0 %v2076_v2  ;;  %1639 = vmatmul.mubr.msk.f32.vlgmr.msra.gmra.mrb[0].mxu1 %vm143_vm1, %v65_v26 }
   0xf   :  { %1899 = vmatpush3.bf16.msra.mxu1 %v2213_v27  ;;  %1649 = vmatprep.mubr.msk.f32.mxu1 %vm2077_vm0, %v2078_v8 }
  0x10   :  { %1900 = vmatprep.subr.bf16.mxu1 %v2076_v2 }
  0x11   :  { %1878 = vmatpush3.bf16.msra.mxu0 %v2200_v23 }
  0x12   :  { %1879 = vmatprep.subr.bf16.mxu0 %v2076_v2 }
  0x13   :  { %1902 = vmatpush3.bf16.msra.mxu1 %v2234_v33 }
  0x14   :  { %1903 = vmatprep.subr.bf16.mxu1 %v2076_v2 }
  0x15   :  { %1881 = vmatpush3.bf16.msra.mxu0 %v2223_v30 }
  0x16   :  { %1882 = vmatprep.subr.bf16.mxu0 %v2076_v2 }
  0x19   :  { %1884 = vmatpush3.bf16.msra.mxu0 %v2240_v34 }
  0x1a   :  { %1885 = vmatprep.subr.bf16.mxu0 %v2076_v2 }
  0x1d   :  { %1887 = vmatpush3.bf16.msra.mxu0 %v2252_v37 }
  0x1e   :  { %1888 = vmatprep.subr.bf16.mxu0 %v2076_v2 }
  0x21   :  { %1890 = vmatpush3.bf16.msra.mxu0 %v2262_v40 }
  0x22   :  { %1933 = vmatprep.subr.bf16.mxu0 %v2076_v2 }
  0x7c   :  { %v306_v62 = vpop.permute.xlu1 %305 }
  0x81   :  { %v69_v43 = vpop.permute.xlu0 %68 }
  0x82   :  { %vm70_vm2 = vcmp.eq.s32.totalorder %v2267_v42, %v69_v43 }
  0x83   :  { %1628 = vmatmul.mubr.msk.f32.vlgmr.msra.gmra.mrb[0].mxu0 %vm70_vm2, %v2079_v44 }
  0x84   :  { %1935 = vmatpush3.bf16.msra.mxu0 %v2180_v17  ;;  %1706 = vmatprep.mubr.msk.f32.mxu0 %vm2077_vm0, %v2078_v8 }
  0x85   :  { %1936 = vmatprep.subr.bf16.mxu0 %v2076_v2 }
  0x88   :  { %1938 = vmatpush3.bf16.msra.mxu0 %v2190_v20 }
  0x89   :  { %1939 = vmatprep.subr.bf16.mxu0 %v2076_v2 }
  0xe1   :  { %v213_v46 = vpop.f32.mrb[0].mxu1 }
  0xe2   :  { %v1640_v47 = vpop.f32.mrb[1].mxu1 }
 0x156   :  { %v139_v48 = vpop.f32.mrb[0].mxu0 }
 0x157   :  { %v1629_v49 = vpop.f32.mrb[1].mxu0  ;;  %1650 = vmatmul.mubr.msk.f32.vlgmr.msra.gmra.mrb[2].mxu1 %vm143_vm1, %v139_v48 }
 0x158   :  { %1660 = vmatprep.mubr.msk.f32.mxu1 %vm2077_vm0, %v2078_v8  ;;  %1905 = vmatpush3.bf16.msra.mxu1 %v2304_v7 }
 0x159   :  { %1906 = vmatprep.subr.bf16.mxu1 %v2076_v2 }
 0x15c   :  { %1908 = vmatpush3.bf16.msra.mxu1 %v2310_v11 }
 0x15d   :  { %1909 = vmatprep.subr.bf16.mxu1 %v2076_v2 }
 0x22a   :  { %v286_v51 = vpop.f32.mrb[2].mxu1 }
 0x22b   :  { %v287_v52 = vadd.f32 %v286_v51, %v213_v46  ;;  %v1651_v53 = vpop.f32.mrb[3].mxu1 }
 0x22d   :  { %v296_v54 = vadd.f32 %v2287_v50, %v287_v52 }
 0x22f   :  { %2043 = vtanh.f32 %v296_v54  ;;  %v1443_v56 = vmul.f32 -1.442695, %v296_v54 }
 0x231   :  { %2045 = vpow2.f32 %v1443_v56 }
 0x239   :  { %v2044_v55 = vpop.eup %2043 }
 0x23a   :  { %310 = vrot.lane.b32.xlu0 %v2044_v55, %s2081_s8 }
 0x23b   :  { %v2046_v57 = vpop.eup %2045 }
 0x23c   :  { %v300_v58 = vadd.f32 1.0, %v2046_v57 }
 0x23e   :  { %2047 = vrcp.f32 %v300_v58 }
 0x248   :  { %v2048_v59 = vpop.eup %2047 }
 0x249   :  { %v308_v63 = vmul.f32 %v2048_v59, %v306_v62 }
 0x2ac   :  { %v311_v60 = vpop.permute.xlu0 %310 }
 0x2ad   :  { %v313_v61 = vmul.f32 %v2048_v59, %v311_v60 }
 0x2af   :  { %315 = vrot.lane.b32.xlu1 %v313_v61, %s2080_s14 }
 0x321   :  { %v316_v0 = vpop.permute.xlu1 %315 }
 0x322   :  { %v2292_v1 = vadd.f32 %v316_v0, %v308_v63 }
 0x324   :  { %2049 = vtanh.f32 %v2292_v1 }
 0x32e   :  { %v2050_v12 = vpop.eup %2049 }
 0x32f   :  { %321 = vrot.lane.b32.xlu0 %v2050_v12, %s2081_s8 }
 0x3a1   :  { %v322_v13 = vpop.permute.xlu0 %321 }
 0x3a2   :  { %v324_v14 = vmul.f32 %v2048_v59, %v322_v13 }
 0x3a4   :  { %332 = vrot.lane.b32.xlu1 %v324_v14, %s2080_s14 }
 0x416   :  { %v333_v15 = vpop.permute.xlu1 %332 }
 0x417   :  { %1661 = vmatmul.mubr.msk.f32.vlgmr.msra.gmra.mrb[4].mxu1 %vm143_vm1, %v333_v15  ;;  %1707 = vmatmul.mubr.msk.f32.vlgmr.msra.gmra.mrb[2].mxu0 %vm143_vm1, %v333_v15 }
 0x418   :  { %1911 = vmatpush3.bf16.msra.mxu1 %v2142_v5  ;;  %1695 = vmatprep.mubr.msk.f32.mxu1 %vm2077_vm0, %v2078_v8 }
 0x419   :  { %1912 = vmatprep.subr.bf16.mxu1 %v2076_v2  ;;  %1941 = vmatpush3.bf16.msra.mxu0 %v2213_v27 }
 0x41a   :  { %1942 = vmatprep.subr.bf16.mxu0 %v2076_v2  ;;  %1717 = vmatprep.mubr.msk.f32.mxu0 %vm2077_vm0, %v2078_v8 }
 0x41c   :  { %1914 = vmatpush3.bf16.msra.mxu1 %v2156_v9 }
 0x41d   :  { %1915 = vmatprep.subr.bf16.mxu1 %v2076_v2  ;;  %1944 = vmatpush3.bf16.msra.mxu0 %v2234_v33 }
 0x41e   :  { %1945 = vmatprep.subr.bf16.mxu0 %v2076_v2 }
 0x420   :  { %1917 = vmatpush3.bf16.msra.mxu1 %v2178_v16 }
 0x421   :  { %1918 = vmatprep.subr.bf16.mxu1 %v2076_v2 }
 0x424   :  { %1920 = vmatpush3.bf16.msra.mxu1 %v2200_v23 }
 0x425   :  { %1921 = vmatprep.subr.bf16.mxu1 %v2076_v2 }
 0x428   :  { %1923 = vmatpush3.bf16.msra.mxu1 %v2223_v30 }
 0x429   :  { %1924 = vmatprep.subr.bf16.mxu1 %v2076_v2 }
 0x42c   :  { %1926 = vmatpush3.bf16.msra.mxu1 %v2240_v34 }
 0x42d   :  { %1927 = vmatprep.subr.bf16.mxu1 %v2076_v2 }
 0x430   :  { %1929 = vmatpush3.bf16.msra.mxu1 %v2252_v37 }
 0x431   :  { %1930 = vmatprep.subr.bf16.mxu1 %v2076_v2 }
 0x434   :  { %1932 = vmatpush3.bf16.msra.mxu1 %v2262_v40 }
 0x435   :  { %1975 = vmatprep.subr.bf16.mxu1 %v2076_v2 }
 0x4ea   :  { %v402_v19 = vpop.f32.mrb[4].mxu1  ;;  %v565_v21 = vpop.f32.mrb[2].mxu0 }
 0x4eb   :  { %v403_v22 = vadd.f32 %v2346_v18, %v402_v19  ;;  %v1662_v24 = vpop.f32.mrb[5].mxu1  ;;  %v1708_v25 = vpop.f32.mrb[3].mxu0 }
 0x4ed   :  { %406 = vmax.xlane.f32.xlu0 %v403_v22 }
 0x57a   :  { %v407_v26 = vpop.xlane.xlu0 %406 }
 0x57b   :  { %vm408_vm3 = vcmp.eq.f32.partialorder %v403_v22, %v407_v26 }
 0x57c   :  { %v409_v28 = vsel %vm408_vm3, %v2267_v42, 128 }
 0x57d   :  { %v411_v29 = vshra.s32 %v409_v28, 16  ;;  %v410_v32 = vand.u32 65535, %v409_v28 }
 0x57f   :  { %v413_v31 = vcvt.s32.f32 %v411_v29  ;;  %v412_v36 = vcvt.s32.f32 %v410_v32 }
 0x581   :  { %414 = vmin.xlane.f32.xlu1 %v413_v31 }
 0x60e   :  { %v415_v35 = vpop.xlane.xlu1 %414 }
 0x60f   :  { %vm416_vm4 = vcmp.eq.f32.partialorder %v413_v31, %v415_v35  ;;  %v421_v39 = vcvt.f32.s32 %v415_v35 }
 0x610   :  { %v417_v38 = vsel %vm416_vm4, %v412_v36, inf }
 0x611   :  { %418 = vmin.xlane.f32.xlu0 %v417_v38  ;;  %v422_v43 = vshll.u32 %v421_v39, 16 }
 0x69e   :  { %v419_v41 = vpop.xlane.xlu0 %418 }
 0x69f   :  { %v420_v45 = vcvt.f32.s32 %v419_v41 }
 0x6a1   :  { %v423_v46 = vadd.s32 %v422_v43, %v420_v45 }
 0x6a3   :  { %425 = vst.msk [vmem:[%s2495_s9] sm:$0xff] %vm424_vm5, %v423_v46  ;;  %vm426_vm6 = vcmp.eq.s32.totalorder %v2267_v42, %v423_v46 }
 0x6a4   :  { %1696 = vmatmul.mubr.msk.f32.vlgmr.msra.gmra.mrb[6].mxu1 %vm426_vm6, %v2079_v44 }
 0x6a5   :  { %1977 = vmatpush3.bf16.msra.mxu1 %v2180_v17  ;;  %1774 = vmatprep.mubr.msk.f32.mxu1 %vm2077_vm0, %v2078_v8 }
 0x6a6   :  { %1978 = vmatprep.subr.bf16.mxu1 %v2076_v2 }
 0x6a9   :  { %1980 = vmatpush3.bf16.msra.mxu1 %v2190_v20 }
 0x6aa   :  { %1981 = vmatprep.subr.bf16.mxu1 %v2076_v2 }
 0x777   :  { %v495_v47 = vpop.f32.mrb[6].mxu1 }
 0x778   :  { %v1697_v48 = vpop.f32.mrb[7].mxu1  ;;  %1718 = vmatmul.mubr.msk.f32.vlgmr.msra.gmra.mrb[4].mxu0 %vm143_vm1, %v495_v47 }
 0x779   :  { %1947 = vmatpush3.bf16.msra.mxu0 %v2304_v7  ;;  %1728 = vmatprep.mubr.msk.f32.mxu0 %vm2077_vm0, %v2078_v8 }
 0x77a   :  { %1948 = vmatprep.subr.bf16.mxu0 %v2076_v2 }
 0x77d   :  { %1950 = vmatpush3.bf16.msra.mxu0 %v2310_v11 }
 0x77e   :  { %1951 = vmatprep.subr.bf16.mxu0 %v2076_v2 }
 0x84b   :  { %v638_v49 = vpop.f32.mrb[4].mxu0 }
 0x84c   :  { %v639_v51 = vadd.f32 %v638_v49, %v565_v21  ;;  %v1719_v52 = vpop.f32.mrb[5].mxu0 }
 0x84e   :  { %v642_v53 = vadd.f32 %v2287_v50, %v639_v51 }
 0x850   :  { %2051 = vtanh.f32 %v642_v53  ;;  %v1450_v55 = vmul.f32 -1.442695, %v642_v53 }
 0x852   :  { %2053 = vpow2.f32 %v1450_v55 }
 0x85a   :  { %v2052_v54 = vpop.eup %2051 }
 0x85b   :  { %652 = vrot.lane.b32.xlu0 %v2052_v54, %s2081_s8 }
 0x85c   :  { %v2054_v56 = vpop.eup %2053 }
 0x85d   :  { %v646_v57 = vadd.f32 1.0, %v2054_v56 }
 0x85f   :  { %2055 = vrcp.f32 %v646_v57 }
 0x869   :  { %v2056_v58 = vpop.eup %2055 }
 0x86a   :  { %v650_v61 = vmul.f32 %v2056_v58, %v2292_v1 }
 0x8cd   :  { %v653_v59 = vpop.permute.xlu0 %652 }
 0x8ce   :  { %v655_v60 = vmul.f32 %v2056_v58, %v653_v59 }
 0x8d0   :  { %657 = vrot.lane.b32.xlu1 %v655_v60, %s2080_s14 }
 0x942   :  { %v658_v62 = vpop.permute.xlu1 %657 }
 0x943   :  { %v2373_v63 = vadd.f32 %v658_v62, %v650_v61 }
 0x945   :  { %2057 = vtanh.f32 %v2373_v63 }
 0x94f   :  { %v2058_v0 = vpop.eup %2057 }
 0x950   :  { %663 = vrot.lane.b32.xlu1 %v2058_v0, %s2081_s8 }
 0x9c2   :  { %v664_v3 = vpop.permute.xlu1 %663 }
 0x9c3   :  { %v666_v4 = vmul.f32 %v2056_v58, %v664_v3 }
 0x9c5   :  { %668 = vrot.lane.b32.xlu0 %v666_v4, %s2080_s14 }
 0xa37   :  { %v669_v6 = vpop.permute.xlu0 %668 }
 0xa38   :  { %1729 = vmatmul.mubr.msk.f32.vlgmr.msra.gmra.mrb[6].mxu0 %vm143_vm1, %v669_v6  ;;  %1775 = vmatmul.mubr.msk.f32.vlgmr.msra.gmra.mrb[8].mxu1 %vm143_vm1, %v669_v6 }
 0xa39   :  { %1953 = vmatpush3.bf16.msra.mxu0 %v2142_v5  ;;  %1763 = vmatprep.mubr.msk.f32.mxu0 %vm2077_vm0, %v2078_v8 }
 0xa3a   :  { %1954 = vmatprep.subr.bf16.mxu0 %v2076_v2  ;;  %1983 = vmatpush3.bf16.msra.mxu1 %v2213_v27 }
 0xa3b   :  { %1984 = vmatprep.subr.bf16.mxu1 %v2076_v2  ;;  %1785 = vmatprep.mubr.msk.f32.mxu1 %vm2077_vm0, %v2078_v8 }
 0xa3d   :  { %1956 = vmatpush3.bf16.msra.mxu0 %v2156_v9 }
 0xa3e   :  { %1957 = vmatprep.subr.bf16.mxu0 %v2076_v2  ;;  %1986 = vmatpush3.bf16.msra.mxu1 %v2234_v33 }
 0xa3f   :  { %1987 = vmatprep.subr.bf16.mxu1 %v2076_v2 }
 0xa41   :  { %1959 = vmatpush3.bf16.msra.mxu0 %v2178_v16 }
 0xa42   :  { %1960 = vmatprep.subr.bf16.mxu0 %v2076_v2 }
 0xa45   :  { %1962 = vmatpush3.bf16.msra.mxu0 %v2200_v23 }
 0xa46   :  { %1963 = vmatprep.subr.bf16.mxu0 %v2076_v2 }
 0xa49   :  { %1965 = vmatpush3.bf16.msra.mxu0 %v2223_v30 }
 0xa4a   :  { %1966 = vmatprep.subr.bf16.mxu0 %v2076_v2 }
 0xa4d   :  { %1968 = vmatpush3.bf16.msra.mxu0 %v2240_v34 }
 0xa4e   :  { %1969 = vmatprep.subr.bf16.mxu0 %v2076_v2 }
 0xa51   :  { %1971 = vmatpush3.bf16.msra.mxu0 %v2252_v37 }
 0xa52   :  { %1972 = vmatprep.subr.bf16.mxu0 %v2076_v2 }
 0xa55   :  { %1974 = vmatpush3.bf16.msra.mxu0 %v2262_v40 }
 0xa56   :  { %2017 = vmatprep.subr.bf16.mxu0 %v2076_v2 }
 0xb0b   :  { %v738_v1 = vpop.f32.mrb[6].mxu0  ;;  %v901_v10 = vpop.f32.mrb[8].mxu1 }
 0xb0c   :  { %v739_v12 = vadd.f32 %v2346_v18, %v738_v1  ;;  %v1730_v13 = vpop.f32.mrb[7].mxu0  ;;  %v1776_v14 = vpop.f32.mrb[9].mxu1 }
 0xb0e   :  { %742 = vmax.xlane.f32.xlu1 %v739_v12 }
 0xb9b   :  { %v743_v15 = vpop.xlane.xlu1 %742 }
 0xb9c   :  { %vm744_vm7 = vcmp.eq.f32.partialorder %v739_v12, %v743_v15 }
 0xb9d   :  { %v745_v19 = vsel %vm744_vm7, %v2267_v42, 128 }
 0xb9e   :  { %v747_v21 = vshra.s32 %v745_v19, 16  ;;  %v746_v24 = vand.u32 65535, %v745_v19 }
 0xba0   :  { %v749_v22 = vcvt.s32.f32 %v747_v21  ;;  %v748_v26 = vcvt.s32.f32 %v746_v24 }
 0xba2   :  { %750 = vmin.xlane.f32.xlu0 %v749_v22 }
 0xc2f   :  { %v751_v25 = vpop.xlane.xlu0 %750 }
 0xc30   :  { %vm752_vm8 = vcmp.eq.f32.partialorder %v749_v22, %v751_v25  ;;  %v757_v29 = vcvt.f32.s32 %v751_v25 }
 0xc31   :  { %v753_v28 = vsel %vm752_vm8, %v748_v26, inf }
 0xc32   :  { %754 = vmin.xlane.f32.xlu0 %v753_v28  ;;  %v758_v32 = vshll.u32 %v757_v29, 16 }
 0xcbf   :  { %v755_v31 = vpop.xlane.xlu0 %754 }
 0xcc0   :  { %v756_v35 = vcvt.f32.s32 %v755_v31 }
 0xcc2   :  { %v759_v36 = vadd.s32 %v758_v32, %v756_v35 }
 0xcc4   :  { %1452 = vst.msk [vmem:[%s2495_s9 + $0x8] sm:$0xff] %vm424_vm5, %v759_v36  ;;  %vm762_vm9 = vcmp.eq.s32.totalorder %v2267_v42, %v759_v36 }
 0xcc5   :  { %1764 = vmatmul.mubr.msk.f32.vlgmr.msra.gmra.mrb[8].mxu0 %vm762_vm9, %v2079_v44 }
 0xcc6   :  { %2019 = vmatpush3.bf16.msra.mxu0 %v2180_v17  ;;  %1842 = vmatprep.mubr.msk.f32.mxu0 %vm2077_vm0, %v2078_v8 }
 0xcc7   :  { %2020 = vmatprep.subr.bf16.mxu0 %v2076_v2 }
 0xcca   :  { %2022 = vmatpush3.bf16.msra.mxu0 %v2190_v20 }
 0xccb   :  { %2023 = vmatprep.subr.bf16.mxu0 %v2076_v2 }
 0xd98   :  { %v831_v38 = vpop.f32.mrb[8].mxu0 }
 0xd99   :  { %v1765_v39 = vpop.f32.mrb[9].mxu0  ;;  %1786 = vmatmul.mubr.msk.f32.vlgmr.msra.gmra.mrb[10].mxu1 %vm143_vm1, %v831_v38 }
 0xd9a   :  { %1989 = vmatpush3.bf16.msra.mxu1 %v2304_v7  ;;  %1796 = vmatprep.mubr.msk.f32.mxu1 %vm2077_vm0, %v2078_v8 }
 0xd9b   :  { %1990 = vmatprep.subr.bf16.mxu1 %v2076_v2 }
 0xd9e   :  { %1992 = vmatpush3.bf16.msra.mxu1 %v2310_v11 }
 0xd9f   :  { %1993 = vmatprep.subr.bf16.mxu1 %v2076_v2 }
 0xe6c   :  { %v974_v17 = vpop.f32.mrb[10].mxu1 }
 0xe6d   :  { %v975_v41 = vadd.f32 %v974_v17, %v901_v10  ;;  %v1787_v20 = vpop.f32.mrb[11].mxu1 }
 0xe6f   :  { %v978_v43 = vadd.f32 %v2287_v50, %v975_v41 }
 0xe71   :  { %2059 = vtanh.f32 %v978_v43  ;;  %v1457_v46 = vmul.f32 -1.442695, %v978_v43 }
 0xe73   :  { %2061 = vpow2.f32 %v1457_v46 }
 0xe7b   :  { %v2060_v45 = vpop.eup %2059 }
 0xe7c   :  { %988 = vrot.lane.b32.xlu1 %v2060_v45, %s2081_s8 }
 0xe7d   :  { %v2062_v47 = vpop.eup %2061 }
 0xe7e   :  { %v982_v48 = vadd.f32 1.0, %v2062_v47 }
 0xe80   :  { %2063 = vrcp.f32 %v982_v48 }
 0xe8a   :  { %v2064_v49 = vpop.eup %2063 }
 0xe8b   :  { %v986_v53 = vmul.f32 %v2064_v49, %v2373_v63 }
 0xeee   :  { %v989_v51 = vpop.permute.xlu1 %988 }
 0xeef   :  { %v991_v52 = vmul.f32 %v2064_v49, %v989_v51 }
 0xef1   :  { %993 = vrot.lane.b32.xlu0 %v991_v52, %s2080_s14 }
 0xf63   :  { %v994_v54 = vpop.permute.xlu0 %993 }
 0xf64   :  { %v2429_v55 = vadd.f32 %v994_v54, %v986_v53 }
 0xf66   :  { %2065 = vtanh.f32 %v2429_v55 }
 0xf70   :  { %v2066_v56 = vpop.eup %2065 }
 0xf71   :  { %999 = vrot.lane.b32.xlu1 %v2066_v56, %s2081_s8 }
 0xfe3   :  { %v1000_v57 = vpop.permute.xlu1 %999 }
 0xfe4   :  { %v1002_v58 = vmul.f32 %v2064_v49, %v1000_v57 }
 0xfe6   :  { %1004 = vrot.lane.b32.xlu1 %v1002_v58, %s2080_s14 }
0x1058   :  { %v1005_v59 = vpop.permute.xlu1 %1004 }
0x1059   :  { %1797 = vmatmul.mubr.msk.f32.vlgmr.msra.gmra.mrb[12].mxu1 %vm143_vm1, %v1005_v59  ;;  %1843 = vmatmul.mubr.msk.f32.vlgmr.msra.gmra.mrb[10].mxu0 %vm143_vm1, %v1005_v59 }
0x105a   :  { %1995 = vmatpush3.bf16.msra.mxu1 %v2142_v5  ;;  %1831 = vmatprep.mubr.msk.f32.mxu1 %vm2077_vm0, %v2078_v8 }
0x105b   :  { %1996 = vmatprep.subr.bf16.mxu1 %v2076_v2  ;;  %2025 = vmatpush3.bf16.msra.mxu0 %v2213_v27 }
0x105c   :  { %2026 = vmatprep.subr.bf16.mxu0 %v2076_v2  ;;  %1853 = vmatprep.mubr.msk.f32.mxu0 %vm2077_vm0, %v2078_v8 }
0x105e   :  { %1998 = vmatpush3.bf16.msra.mxu1 %v2156_v9 }
0x105f   :  { %1999 = vmatprep.subr.bf16.mxu1 %v2076_v2  ;;  %2028 = vmatpush3.bf16.msra.mxu0 %v2234_v33 }
0x1060   :  { %2029 = vmatprep.subr.bf16.mxu0 %v2076_v2 }
0x1062   :  { %2001 = vmatpush3.bf16.msra.mxu1 %v2178_v16 }
0x1063   :  { %2002 = vmatprep.subr.bf16.mxu1 %v2076_v2 }
0x1066   :  { %2004 = vmatpush3.bf16.msra.mxu1 %v2200_v23 }
0x1067   :  { %2005 = vmatprep.subr.bf16.mxu1 %v2076_v2 }
0x106a   :  { %2007 = vmatpush3.bf16.msra.mxu1 %v2223_v30 }
0x106b   :  { %2008 = vmatprep.subr.bf16.mxu1 %v2076_v2 }
0x106e   :  { %2010 = vmatpush3.bf16.msra.mxu1 %v2240_v34 }
0x106f   :  { %2011 = vmatprep.subr.bf16.mxu1 %v2076_v2 }
0x1072   :  { %2013 = vmatpush3.bf16.msra.mxu1 %v2252_v37 }
0x1073   :  { %2014 = vmatprep.subr.bf16.mxu1 %v2076_v2 }
0x1076   :  { %2016 = vmatpush3.bf16.msra.mxu1 %v2262_v40 }
0x112c   :  { %v1074_v5 = vpop.f32.mrb[12].mxu1  ;;  %v1237_v9 = vpop.f32.mrb[10].mxu0 }
0x112d   :  { %v1075_v16 = vadd.f32 %v2346_v18, %v1074_v5  ;;  %v1798_v23 = vpop.f32.mrb[13].mxu1  ;;  %v1844_v27 = vpop.f32.mrb[11].mxu0 }
0x112f   :  { %1078 = vmax.xlane.f32.xlu0 %v1075_v16 }
0x11bc   :  { %v1079_v30 = vpop.xlane.xlu0 %1078 }
0x11bd   :  { %vm1080_vm10 = vcmp.eq.f32.partialorder %v1075_v16, %v1079_v30 }
0x11be   :  { %v1081_v33 = vsel %vm1080_vm10, %v2267_v42, 128 }
0x11bf   :  { %v1083_v34 = vshra.s32 %v1081_v33, 16  ;;  %v1082_v61 = vand.u32 65535, %v1081_v33 }
0x11c1   :  { %v1085_v60 = vcvt.s32.f32 %v1083_v34  ;;  %v1084_v62 = vcvt.s32.f32 %v1082_v61 }
0x11c3   :  { %1086 = vmin.xlane.f32.xlu1 %v1085_v60 }
0x1250   :  { %v1087_v37 = vpop.xlane.xlu1 %1086 }
0x1251   :  { %vm1088_vm11 = vcmp.eq.f32.partialorder %v1085_v60, %v1087_v37  ;;  %v1093_v40 = vcvt.f32.s32 %v1087_v37 }
0x1252   :  { %v1089_v63 = vsel %vm1088_vm11, %v1084_v62, inf }
0x1253   :  { %1090 = vmin.xlane.f32.xlu0 %v1089_v63  ;;  %v1094_v3 = vshll.u32 %v1093_v40, 16 }
0x12e0   :  { %v1091_v0 = vpop.xlane.xlu0 %1090 }
0x12e1   :  { %v1092_v4 = vcvt.f32.s32 %v1091_v0 }
0x12e3   :  { %v1095_v6 = vadd.s32 %v1094_v3, %v1092_v4 }
0x12e5   :  { %1459 = vst.msk [vmem:[%s2495_s9 + $0x10] sm:$0xff] %vm424_vm5, %v1095_v6  ;;  %vm1098_vm12 = vcmp.eq.s32.totalorder %v2267_v42, %v1095_v6 }
0x12e6   :  { %1832 = vmatmul.mubr.msk.f32.vlgmr.msra.gmra.mrb[14].mxu1 %vm1098_vm12, %v2079_v44 }
0x13b9   :  { %v1167_v1 = vpop.f32.mrb[14].mxu1 }
0x13ba   :  { %v1833_v10 = vpop.f32.mrb[15].mxu1  ;;  %1854 = vmatmul.mubr.msk.f32.vlgmr.msra.gmra.mrb[12].mxu0 %vm143_vm1, %v1167_v1 }
0x13bb   :  { %2031 = vmatpush3.bf16.msra.mxu0 %v2304_v7  ;;  %1864 = vmatprep.mubr.msk.f32.mxu0 %vm2077_vm0, %v2078_v8 }
0x13bc   :  { %2032 = vmatprep.subr.bf16.mxu0 %v2076_v2 }
0x13bf   :  { %2034 = vmatpush3.bf16.msra.mxu0 %v2310_v11 }
0x148d   :  { %v1310_v12 = vpop.f32.mrb[12].mxu0 }
0x148e   :  { %v1311_v13 = vadd.f32 %v1310_v12, %v1237_v9  ;;  %v1855_v14 = vpop.f32.mrb[13].mxu0 }
0x1490   :  { %v1314_v15 = vadd.f32 %v2287_v50, %v1311_v13 }
0x1492   :  { %2067 = vtanh.f32 %v1314_v15  ;;  %v1464_v19 = vmul.f32 -1.442695, %v1314_v15 }
0x1494   :  { %2069 = vpow2.f32 %v1464_v19 }
0x149c   :  { %v2068_v44 = vpop.eup %2067 }
0x149d   :  { %1324 = vrot.lane.b32.xlu0 %v2068_v44, %s2081_s8 }
0x149e   :  { %v2070_v21 = vpop.eup %2069 }
0x149f   :  { %v1318_v7 = vadd.f32 1.0, %v2070_v21 }
0x14a1   :  { %2071 = vrcp.f32 %v1318_v7 }
0x14ab   :  { %v2072_v22 = vpop.eup %2071 }
0x14ac   :  { %v1322_v2 = vmul.f32 %v2072_v22, %v2429_v55 }
0x150f   :  { %v1325_v8 = vpop.permute.xlu0 %1324 }
0x1510   :  { %v1327_v24 = vmul.f32 %v2072_v22, %v1325_v8 }
0x1512   :  { %1329 = vrot.lane.b32.xlu1 %v1327_v24, %s2080_s14 }
0x1584   :  { %v1330_v11 = vpop.permute.xlu1 %1329 }
0x1585   :  { %v1332_v25 = vadd.f32 %v1330_v11, %v1322_v2 }
0x1587   :  { %2073 = vtanh.f32 %v1332_v25 }
0x1591   :  { %v2074_v50 = vpop.eup %2073 }
0x1592   :  { %1335 = vrot.lane.b32.xlu1 %v2074_v50, %s2081_s8 }
0x1604   :  { %v1336_v26 = vpop.permute.xlu1 %1335 }
0x1605   :  { %v1338_v28 = vmul.f32 %v2072_v22, %v1336_v26 }
0x1607   :  { %1340 = vrot.lane.b32.xlu0 %v1338_v28, %s2080_s14 }
0x1679   :  { %v1341_v29 = vpop.permute.xlu0 %1340 }
0x167a   :  { %1865 = vmatmul.mubr.msk.f32.vlgmr.msra.gmra.mrb[14].mxu0 %vm143_vm1, %v1341_v29 }
0x174d   :  { %v1410_v31 = vpop.f32.mrb[14].mxu0 }
0x174e   :  { %v1411_v32 = vadd.f32 %v2346_v18, %v1410_v31  ;;  %v1866_v35 = vpop.f32.mrb[15].mxu0 }
0x1750   :  { %1414 = vmax.xlane.f32.xlu1 %v1411_v32 }
0x17dd   :  { %v1415_v36 = vpop.xlane.xlu1 %1414 }
0x17de   :  { %vm1416_vm13 = vcmp.eq.f32.partialorder %v1411_v32, %v1415_v36 }
0x17df   :  { %v1417_v38 = vsel %vm1416_vm13, %v2267_v42, 128 }
0x17e0   :  { %v1419_v39 = vshra.s32 %v1417_v38, 16  ;;  %v1418_v41 = vand.u32 65535, %v1417_v38 }
0x17e2   :  { %v1421_v17 = vcvt.s32.f32 %v1419_v39  ;;  %v1420_v43 = vcvt.s32.f32 %v1418_v41 }
0x17e4   :  { %1422 = vmin.xlane.f32.xlu0 %v1421_v17 }
0x1871   :  { %v1423_v20 = vpop.xlane.xlu0 %1422 }
0x1872   :  { %vm1424_vm14 = vcmp.eq.f32.partialorder %v1421_v17, %v1423_v20  ;;  %v1429_v46 = vcvt.f32.s32 %v1423_v20 }
0x1873   :  { %v1425_v45 = vsel %vm1424_vm14, %v1420_v43, inf }
0x1874   :  { %1426 = vmin.xlane.f32.xlu0 %v1425_v45  ;;  %v1430_v48 = vshll.u32 %v1429_v46, 16 }
0x1901   :  { %v1427_v47 = vpop.xlane.xlu0 %1426 }
0x1902   :  { %v1428_v49 = vcvt.f32.s32 %v1427_v47 }
0x1904   :  { %v1431_v18 = vadd.s32 %v1430_v48, %v1428_v49 }
0x1906   :  { %1466 = vst.msk [vmem:[%s2495_s9 + $0x18] sm:$0xff] %vm424_vm5, %v1431_v18 }

</bundles_post_ra>
